<compile_context>
chip_gen: v6e
topology: v6e:2x2x1
jax: 0.10.0
libtpu: 0.0.40
codegen_flags: <defaults>
</compile_context>

<pallas_src>
import functools

import jax
import jax.numpy as jnp
from jax import lax
from jax.experimental import pallas as pl
from jax.experimental.pallas import tpu as pltpu

_EPS = 1e-5                  # torch.nn.BatchNorm1d default eps
_ACT_DTYPE = jnp.bfloat16    # inter-layer activation storage dtype
_TM_MAX = 1024               # rows per M tile
_TN_MAX = 512                # output channels per tile (lane-dense, >=128)


def _round_up(x, m):
    return (x + m - 1) // m * m


# ---------------------------------------------------------------------------
# Kernel A: per-layer input statistics, M-tiled reduction.
#   x block: [tm, Cin]   outputs (resident accumulators): sum [1,Cin], Gram [Cin,Cin]
# ---------------------------------------------------------------------------
def _stats_kernel(x_ref, sum_ref, gram_ref):
    @pl.when(pl.program_id(0) == 0)
    def _init():
        sum_ref[...] = jnp.zeros_like(sum_ref)
        gram_ref[...] = jnp.zeros_like(gram_ref)

    x = x_ref[...].astype(jnp.float32)                       # [tm, Cin]
    sum_ref[...] += jnp.sum(x, axis=0, keepdims=True)        # [1, Cin]
    gram_ref[...] += lax.dot_general(                        # x^T x -> [Cin, Cin]
        x, x, (((0,), (0,)), ((), ())), preferred_element_type=jnp.float32)


def _input_stats(x, tm):
    m_pad, cin = x.shape
    return pl.pallas_call(
        _stats_kernel,
        out_shape=(jax.ShapeDtypeStruct((1, cin), jnp.float32),
                   jax.ShapeDtypeStruct((cin, cin), jnp.float32)),
        grid=(m_pad // tm,),
        in_specs=[pl.BlockSpec((tm, cin), lambda m: (m, 0))],
        out_specs=(pl.BlockSpec((1, cin), lambda m: (0, 0)),
                   pl.BlockSpec((cin, cin), lambda m: (0, 0))),
        compiler_params=pltpu.CompilerParams(
            dimension_semantics=("arbitrary",)),
    )(x)


# ---------------------------------------------------------------------------
# Kernel B: matmul + per-channel affine (folded train-mode BN) + ReLU.
#   x: [tm, Cin]  w: [Cin, tn]  scale/shift: [1, tn]  out: [tm, tn] (bf16)
# Pad rows (if M was padded to a tile multiple) are forced to zero so the next
# layer's statistics stay exact.
# ---------------------------------------------------------------------------
def _matmul_affine_relu_kernel(x_ref, w_ref, scale_ref, shift_ref, o_ref, *,
                               valid_rows, tm):
    y = jnp.dot(x_ref[...], w_ref[...], preferred_element_type=jnp.float32)
    y = jnp.maximum(y * scale_ref[...] + shift_ref[...], 0.0)
    if valid_rows is not None:
        row = pl.program_id(0) * tm + lax.broadcasted_iota(jnp.int32, y.shape, 0)
        y = jnp.where(row < valid_rows, y, 0.0)
    o_ref[...] = y.astype(o_ref.dtype)


def conv_bn_relu(x, w, gamma, beta, *, m_valid, tm, out_dtype=_ACT_DTYPE):
    """Fused Conv1d(k=1, no bias needed) + train-mode BatchNorm1d + ReLU."""
    m_pad, cin = x.shape
    cout = w.shape[1]
    tn = min(_TN_MAX, cout)
    assert cout % tn == 0 and m_pad % tm == 0

    # ---- pass 1: cheap M-tiled input stats, then analytic BN fold ----------
    x_sum, gram = _input_stats(x, tm)
    w_mx = w.astype(_ACT_DTYPE)             # MXU operand dtype (bf16)
    w_f32 = w_mx.astype(jnp.float32)        # stats use the same rounded weights
    inv_m = 1.0 / float(m_valid)
    mean_x = x_sum * inv_m                                    # [1, Cin]
    cov_x = gram * inv_m - mean_x.T @ mean_x                  # [Cin, Cin] (biased)
    mean_y = (mean_x @ w_f32)[0]                              # [Cout]
    var_y = jnp.maximum(jnp.sum(w_f32 * (cov_x @ w_f32), axis=0), 0.0)
    scale = gamma * lax.rsqrt(var_y + _EPS)
    shift = beta - mean_y * scale

    # ---- pass 2: fully parallel, pipelined (M, Cout)-tiled apply -----------
    kernel = functools.partial(
        _matmul_affine_relu_kernel,
        valid_rows=None if m_valid == m_pad else m_valid, tm=tm)
    return pl.pallas_call(
        kernel,
        out_shape=jax.ShapeDtypeStruct((m_pad, cout), out_dtype),
        grid=(m_pad // tm, cout // tn),
        in_specs=[
            pl.BlockSpec((tm, cin), lambda i, j: (i, 0)),
            pl.BlockSpec((cin, tn), lambda i, j: (0, j)),
            pl.BlockSpec((1, tn), lambda i, j: (0, j)),
            pl.BlockSpec((1, tn), lambda i, j: (0, j)),
        ],
        out_specs=pl.BlockSpec((tm, tn), lambda i, j: (i, j)),
        compiler_params=pltpu.CompilerParams(
            dimension_semantics=("parallel", "parallel")),
    )(x, w_mx, scale.reshape(1, -1), shift.reshape(1, -1))


# ---------------------------------------------------------------------------
# Kernel C: per-batch "fix_features" + symmetric max pooling (+ Flatten).
#   block: [Bt, N, K]  ->  out block [Bt, 1, K]
# ---------------------------------------------------------------------------
def _fix_pool_kernel(f_ref, o_ref):
    f = f_ref[...].astype(jnp.float32)                              # [Bt, N, K]
    pooled = jnp.max(f, axis=1, keepdims=True)                      # [Bt, 1, K]
    diff = f - pooled
    dists = jnp.sqrt(jnp.sum(diff * diff, axis=-1, keepdims=True))  # [Bt, N, 1]
    m = jnp.max(dists, axis=1, keepdims=True)
    e = jnp.exp(dists - m)
    sm = e * pl.reciprocal(jnp.sum(e, axis=1, keepdims=True), approx=True)
    re_scores = 1.0 - sm                                            # [Bt, N, 1]
    o_ref[...] = jnp.max(f * re_scores, axis=1, keepdims=True).astype(o_ref.dtype)


def fix_and_pool(features):
    # TODO(synk): for very large N (N*K*itemsize of several MiB per element)
    # this should become a streaming pass with N tiled and running max/sum in
    # scratch; the per-step block here is sized to stay well inside VMEM.
    b, n, k = features.shape
    bytes_per_b = n * k * features.dtype.itemsize
    bt = max(1, min(b, (4 << 20) // max(bytes_per_b, 1)))  # amortize step overhead
    while b % bt:
        bt -= 1
    out = pl.pallas_call(
        _fix_pool_kernel,
        out_shape=jax.ShapeDtypeStruct((b, 1, k), jnp.float32),
        grid=(b // bt,),
        in_specs=[pl.BlockSpec((bt, n, k), lambda i: (i, 0, 0))],
        out_specs=pl.BlockSpec((bt, 1, k), lambda i: (i, 0, 0)),
        compiler_params=pltpu.CompilerParams(
            dimension_semantics=("parallel",)),
    )(features)
    return out.reshape(b, k)     # == Flatten: x.view(x.size(0), -1)


# ---------------------------------------------------------------------------
# Parameter setup (deterministic, in-script). Channel plan for dim_k, scale:
#   h1: 3 -> 64 -> 64 ; h2: 64 -> 64 -> 128 -> dim_k
# Conv weights/biases ~ U(-1/sqrt(Cin), 1/sqrt(Cin)); BN gamma=1, beta=0.
# (The conv bias is kept for parity with the torch module but cancels exactly
#  under train-mode BN, so the forward pass never uses it.)
# ---------------------------------------------------------------------------
def init_params(key, dim_k=1024, scale=1):
    ch = [3,
          int(64 / scale), int(64 / scale),                       # h1
          int(64 / scale), int(128 / scale), int(dim_k / scale)]  # h2
    params = []
    for cin, cout in zip(ch[:-1], ch[1:]):
        key, kw, kb = jax.random.split(key, 3)
        bound = 1.0 / float(jnp.sqrt(jnp.float32(cin)))
        w = jax.random.uniform(kw, (cin, cout), jnp.float32, -bound, bound)
        b = jax.random.uniform(kb, (cout,), jnp.float32, -bound, bound)
        gamma = jnp.ones((cout,), jnp.float32)
        beta = jnp.zeros((cout,), jnp.float32)
        params.append((w, b, gamma, beta))
    return params


@jax.jit
def pointnet_features(points, params):
    """[B, N, 3] -> [B, dim_k]"""
    b, n, c = points.shape
    m = b * n
    tm = _TM_MAX if m >= _TM_MAX else _round_up(m, 16)
    m_pad = _round_up(m, tm)
    cin0 = _round_up(c, 8)          # pad xyz channels to a sublane-friendly width

    x = points.reshape(m, c).astype(jnp.float32)
    x = jnp.pad(x, ((0, m_pad - m), (0, cin0 - c))).astype(_ACT_DTYPE)

    for (w, _bias, gamma, beta) in params:     # h1 then h2 shared-MLP layers
        if w.shape[0] != x.shape[1]:           # first layer: zero rows for padded lanes
            w = jnp.pad(w, ((0, x.shape[1] - w.shape[0]), (0, 0)))
        # `_bias` cancels under train-mode BatchNorm -> intentionally unused.
        x = conv_bn_relu(x, w, gamma, beta, m_valid=m, tm=tm)

    feats = x[:m].reshape(b, n, -1)            # h2 output, channels-last
    return fix_and_pool(feats)                 # fix_features + symfn_max + Flatten


if __name__ == "__main__":
    key = jax.random.PRNGKey(0)
    k_pts, k_par = jax.random.split(key)
    B, N, dim_k = 2, 16, 1024
    points = jax.random.normal(k_pts, (B, N, 3), jnp.float32)
    params = init_params(k_par, dim_k=dim_k, scale=1)

    out = pointnet_features(points, params)
    jax.block_until_ready(out)
    assert out.shape == (B, dim_k), out.shape
    assert out.dtype == jnp.float32
    print("KERNEL_OK")
</pallas_src>

<mosaic_0001>
module attributes {stable_mosaic.version = 11 : i64} {
  func.func @_stats_kernel(%arg0: i32, %arg1: memref<32x8xbf16, #tpu.memory_space<vmem>>, %arg2: memref<1x8xf32, #tpu.memory_space<vmem>>, %arg3: memref<8x8xf32, #tpu.memory_space<vmem>>) attributes {dimension_semantics = [#tpu.dimension_semantics<arbitrary>], iteration_bounds = array<i64: 1>, scalar_prefetch = 0 : i64, scratch_operands = 0 : i64, tpu.core_type = #tpu.core_type<tc>, window_params = [{transform_indices = @transform_0, window_bounds = array<i64: 32, 8>}, {pipeline_mode = #tpu.pipeline_mode<synchronous>, transform_indices = @transform_1, window_bounds = array<i64: 1, 8>}, {pipeline_mode = #tpu.pipeline_mode<synchronous>, transform_indices = @transform_2, window_bounds = array<i64: 8, 8>}]} {
    %c0_i32 = arith.constant 0 : i32
    %0 = arith.cmpi eq, %arg0, %c0_i32 : i32
    %1 = arith.extui %0 : i1 to i32
    %c0_i32_0 = arith.constant 0 : i32
    %2 = arith.cmpi ne, %1, %c0_i32_0 : i32
    scf.if %2 {
      %cst_11 = arith.constant 0.000000e+00 : f32
      %14 = vector.broadcast %cst_11 : f32 to vector<1x8xf32>
      %c0_12 = arith.constant 0 : index
      %c0_13 = arith.constant 0 : index
      %15 = vector.load %arg2[%c0_12, %c0_13] : memref<1x8xf32, #tpu.memory_space<vmem>>, vector<1x8xf32>
      tpu.vector_store %arg2[%c0_12, %c0_13], %14 {strides = array<i32>} : memref<1x8xf32, #tpu.memory_space<vmem>>, vector<1x8xf32>,
      %cst_14 = arith.constant 0.000000e+00 : f32
      %16 = vector.broadcast %cst_14 : f32 to vector<8x8xf32>
      %c0_15 = arith.constant 0 : index
      %c0_16 = arith.constant 0 : index
      %17 = vector.load %arg3[%c0_15, %c0_16] : memref<8x8xf32, #tpu.memory_space<vmem>>, vector<8x8xf32>
      tpu.vector_store %arg3[%c0_15, %c0_16], %16 {strides = array<i32>} : memref<8x8xf32, #tpu.memory_space<vmem>>, vector<8x8xf32>,
    } else {
    }
    %c0 = arith.constant 0 : index
    %c0_1 = arith.constant 0 : index
    %3 = vector.load %arg1[%c0, %c0_1] : memref<32x8xbf16, #tpu.memory_space<vmem>>, vector<32x8xbf16>
    %4 = arith.extf %3 : vector<32x8xbf16> to vector<32x8xf32>
    %c0_2 = arith.constant 0 : index
    %c0_3 = arith.constant 0 : index
    %5 = vector.load %arg2[%c0_2, %c0_3] : memref<1x8xf32, #tpu.memory_space<vmem>>, vector<1x8xf32>
    %cst = arith.constant dense<0.000000e+00> : vector<8xf32>
    %6 = vector.multi_reduction <add>, %4, %cst [0] : vector<32x8xf32> to vector<8xf32>
    %7 = vector.shape_cast %6 : vector<8xf32> to vector<1x8xf32>
    %8 = arith.addf %5, %7 : vector<1x8xf32>
    %c0_4 = arith.constant 0 : index
    %c0_5 = arith.constant 0 : index
    %9 = vector.load %arg2[%c0_4, %c0_5] : memref<1x8xf32, #tpu.memory_space<vmem>>, vector<1x8xf32>
    tpu.vector_store %arg2[%c0_4, %c0_5], %8 {strides = array<i32>} : memref<1x8xf32, #tpu.memory_space<vmem>>, vector<1x8xf32>,
    %c0_6 = arith.constant 0 : index
    %c0_7 = arith.constant 0 : index
    %10 = vector.load %arg3[%c0_6, %c0_7] : memref<8x8xf32, #tpu.memory_space<vmem>>, vector<8x8xf32>
    %cst_8 = arith.constant dense<0.000000e+00> : vector<8x8xf32>
    %11 = tpu.matmul %4, %4, %cst_8 {dimension_numbers = #tpu.dot_dimension_numbers<[0], [0], [1], [1], [0, 1, 1, 1], [], []>} : vector<32x8xf32>, vector<32x8xf32>, vector<8x8xf32> -> vector<8x8xf32>
    %12 = arith.addf %10, %11 : vector<8x8xf32>
    %c0_9 = arith.constant 0 : index
    %c0_10 = arith.constant 0 : index
    %13 = vector.load %arg3[%c0_9, %c0_10] : memref<8x8xf32, #tpu.memory_space<vmem>>, vector<8x8xf32>
    tpu.vector_store %arg3[%c0_9, %c0_10], %12 {strides = array<i32>} : memref<8x8xf32, #tpu.memory_space<vmem>>, vector<8x8xf32>,
    return
  }
  func.func @transform_0(%arg0: i32) -> (i32, i32) {
    %c0_i32 = arith.constant 0 : i32
    %c0_i32_0 = arith.constant 0 : i32
    return %arg0, %c0_i32 : i32, i32
  }
  func.func @transform_1(%arg0: i32) -> (i32, i32) {
    %c0_i32 = arith.constant 0 : i32
    %c0_i32_0 = arith.constant 0 : i32
    %c0_i32_1 = arith.constant 0 : i32
    return %c0_i32, %c0_i32_0 : i32, i32
  }
  func.func @transform_2(%arg0: i32) -> (i32, i32) {
    %c0_i32 = arith.constant 0 : i32
    %c0_i32_0 = arith.constant 0 : i32
    %c0_i32_1 = arith.constant 0 : i32
    return %c0_i32, %c0_i32_0 : i32, i32
  }
}

module attributes {stable_mosaic.version = 11 : i64} {
  func.func @_matmul_affine_relu_kernel(%arg0: i32, %arg1: i32, %arg2: memref<32x8xbf16, #tpu.memory_space<vmem>>, %arg3: memref<8x64xbf16, #tpu.memory_space<vmem>>, %arg4: memref<1x64xf32, #tpu.memory_space<vmem>>, %arg5: memref<1x64xf32, #tpu.memory_space<vmem>>, %arg6: memref<32x64xbf16, #tpu.memory_space<vmem>>) attributes {dimension_semantics = [#tpu.dimension_semantics<parallel>, #tpu.dimension_semantics<parallel>], iteration_bounds = array<i64: 1, 1>, scalar_prefetch = 0 : i64, scratch_operands = 0 : i64, tpu.core_type = #tpu.core_type<tc>, window_params = [{transform_indices = @transform_0, window_bounds = array<i64: 32, 8>}, {transform_indices = @transform_1, window_bounds = array<i64: 8, 64>}, {transform_indices = @transform_2, window_bounds = array<i64: 1, 64>}, {transform_indices = @transform_3, window_bounds = array<i64: 1, 64>}, {transform_indices = @transform_4, window_bounds = array<i64: 32, 64>}]} {
    %c0 = arith.constant 0 : index
    %c0_0 = arith.constant 0 : index
    %0 = vector.load %arg2[%c0, %c0_0] : memref<32x8xbf16, #tpu.memory_space<vmem>>, vector<32x8xbf16>
    %c0_1 = arith.constant 0 : index
    %c0_2 = arith.constant 0 : index
    %1 = vector.load %arg3[%c0_1, %c0_2] : memref<8x64xbf16, #tpu.memory_space<vmem>>, vector<8x64xbf16>
    %cst = arith.constant dense<0.000000e+00> : vector<32x64xf32>
    %2 = tpu.matmul %0, %1, %cst {dimension_numbers = #tpu.dot_dimension_numbers<[1], [0], [0], [1], [0, 0, 1, 1], [], []>} : vector<32x8xbf16>, vector<8x64xbf16>, vector<32x64xf32> -> vector<32x64xf32>
    %c0_3 = arith.constant 0 : index
    %c0_4 = arith.constant 0 : index
    %3 = vector.load %arg4[%c0_3, %c0_4] : memref<1x64xf32, #tpu.memory_space<vmem>>, vector<1x64xf32>
    %4 = vector.broadcast %3 : vector<1x64xf32> to vector<32x64xf32>
    %5 = arith.mulf %2, %4 : vector<32x64xf32>
    %c0_5 = arith.constant 0 : index
    %c0_6 = arith.constant 0 : index
    %6 = vector.load %arg5[%c0_5, %c0_6] : memref<1x64xf32, #tpu.memory_space<vmem>>, vector<1x64xf32>
    %7 = vector.broadcast %6 : vector<1x64xf32> to vector<32x64xf32>
    %8 = arith.addf %5, %7 : vector<32x64xf32>
    %cst_7 = arith.constant 0.000000e+00 : f32
    %9 = vector.broadcast %cst_7 : f32 to vector<32x64xf32>
    %10 = arith.maximumf %8, %9 : vector<32x64xf32>
    %11 = arith.truncf %10 : vector<32x64xf32> to vector<32x64xbf16>
    %c0_8 = arith.constant 0 : index
    %c0_9 = arith.constant 0 : index
    %12 = vector.load %arg6[%c0_8, %c0_9] : memref<32x64xbf16, #tpu.memory_space<vmem>>, vector<32x64xbf16>
    tpu.vector_store %arg6[%c0_8, %c0_9], %11 {strides = array<i32>} : memref<32x64xbf16, #tpu.memory_space<vmem>>, vector<32x64xbf16>,
    return
  }
  func.func @transform_0(%arg0: i32, %arg1: i32) -> (i32, i32) {
    %c0_i32 = arith.constant 0 : i32
    %c0_i32_0 = arith.constant 0 : i32
    return %arg0, %c0_i32 : i32, i32
  }
  func.func @transform_1(%arg0: i32, %arg1: i32) -> (i32, i32) {
    %c0_i32 = arith.constant 0 : i32
    %c0_i32_0 = arith.constant 0 : i32
    return %c0_i32, %arg1 : i32, i32
  }
  func.func @transform_2(%arg0: i32, %arg1: i32) -> (i32, i32) {
    %c0_i32 = arith.constant 0 : i32
    %c0_i32_0 = arith.constant 0 : i32
    return %c0_i32, %arg1 : i32, i32
  }
  func.func @transform_3(%arg0: i32, %arg1: i32) -> (i32, i32) {
    %c0_i32 = arith.constant 0 : i32
    %c0_i32_0 = arith.constant 0 : i32
    return %c0_i32, %arg1 : i32, i32
  }
  func.func @transform_4(%arg0: i32, %arg1: i32) -> (i32, i32) {
    %c0_i32 = arith.constant 0 : i32
    return %arg0, %arg1 : i32, i32
  }
}

module attributes {stable_mosaic.version = 11 : i64} {
  func.func @_stats_kernel(%arg0: i32, %arg1: memref<32x64xbf16, #tpu.memory_space<vmem>>, %arg2: memref<1x64xf32, #tpu.memory_space<vmem>>, %arg3: memref<64x64xf32, #tpu.memory_space<vmem>>) attributes {dimension_semantics = [#tpu.dimension_semantics<arbitrary>], iteration_bounds = array<i64: 1>, scalar_prefetch = 0 : i64, scratch_operands = 0 : i64, tpu.core_type = #tpu.core_type<tc>, window_params = [{transform_indices = @transform_0, window_bounds = array<i64: 32, 64>}, {pipeline_mode = #tpu.pipeline_mode<synchronous>, transform_indices = @transform_1, window_bounds = array<i64: 1, 64>}, {pipeline_mode = #tpu.pipeline_mode<synchronous>, transform_indices = @transform_2, window_bounds = array<i64: 64, 64>}]} {
    %c0_i32 = arith.constant 0 : i32
    %0 = arith.cmpi eq, %arg0, %c0_i32 : i32
    %1 = arith.extui %0 : i1 to i32
    %c0_i32_0 = arith.constant 0 : i32
    %2 = arith.cmpi ne, %1, %c0_i32_0 : i32
    scf.if %2 {
      %cst_11 = arith.constant 0.000000e+00 : f32
      %14 = vector.broadcast %cst_11 : f32 to vector<1x64xf32>
      %c0_12 = arith.constant 0 : index
      %c0_13 = arith.constant 0 : index
      %15 = vector.load %arg2[%c0_12, %c0_13] : memref<1x64xf32, #tpu.memory_space<vmem>>, vector<1x64xf32>
      tpu.vector_store %arg2[%c0_12, %c0_13], %14 {strides = array<i32>} : memref<1x64xf32, #tpu.memory_space<vmem>>, vector<1x64xf32>,
      %cst_14 = arith.constant 0.000000e+00 : f32
      %16 = vector.broadcast %cst_14 : f32 to vector<64x64xf32>
      %c0_15 = arith.constant 0 : index
      %c0_16 = arith.constant 0 : index
      %17 = vector.load %arg3[%c0_15, %c0_16] : memref<64x64xf32, #tpu.memory_space<vmem>>, vector<64x64xf32>
      tpu.vector_store %arg3[%c0_15, %c0_16], %16 {strides = array<i32>} : memref<64x64xf32, #tpu.memory_space<vmem>>, vector<64x64xf32>,
    } else {
    }
    %c0 = arith.constant 0 : index
    %c0_1 = arith.constant 0 : index
    %3 = vector.load %arg1[%c0, %c0_1] : memref<32x64xbf16, #tpu.memory_space<vmem>>, vector<32x64xbf16>
    %4 = arith.extf %3 : vector<32x64xbf16> to vector<32x64xf32>
    %c0_2 = arith.constant 0 : index
    %c0_3 = arith.constant 0 : index
    %5 = vector.load %arg2[%c0_2, %c0_3] : memref<1x64xf32, #tpu.memory_space<vmem>>, vector<1x64xf32>
    %cst = arith.constant dense<0.000000e+00> : vector<64xf32>
    %6 = vector.multi_reduction <add>, %4, %cst [0] : vector<32x64xf32> to vector<64xf32>
    %7 = vector.shape_cast %6 : vector<64xf32> to vector<1x64xf32>
    %8 = arith.addf %5, %7 : vector<1x64xf32>
    %c0_4 = arith.constant 0 : index
    %c0_5 = arith.constant 0 : index
    %9 = vector.load %arg2[%c0_4, %c0_5] : memref<1x64xf32, #tpu.memory_space<vmem>>, vector<1x64xf32>
    tpu.vector_store %arg2[%c0_4, %c0_5], %8 {strides = array<i32>} : memref<1x64xf32, #tpu.memory_space<vmem>>, vector<1x64xf32>,
    %c0_6 = arith.constant 0 : index
    %c0_7 = arith.constant 0 : index
    %10 = vector.load %arg3[%c0_6, %c0_7] : memref<64x64xf32, #tpu.memory_space<vmem>>, vector<64x64xf32>
    %cst_8 = arith.constant dense<0.000000e+00> : vector<64x64xf32>
    %11 = tpu.matmul %4, %4, %cst_8 {dimension_numbers = #tpu.dot_dimension_numbers<[0], [0], [1], [1], [0, 1, 1, 1], [], []>} : vector<32x64xf32>, vector<32x64xf32>, vector<64x64xf32> -> vector<64x64xf32>
    %12 = arith.addf %10, %11 : vector<64x64xf32>
    %c0_9 = arith.constant 0 : index
    %c0_10 = arith.constant 0 : index
    %13 = vector.load %arg3[%c0_9, %c0_10] : memref<64x64xf32, #tpu.memory_space<vmem>>, vector<64x64xf32>
    tpu.vector_store %arg3[%c0_9, %c0_10], %12 {strides = array<i32>} : memref<64x64xf32, #tpu.memory_space<vmem>>, vector<64x64xf32>,
    return
  }
  func.func @transform_0(%arg0: i32) -> (i32, i32) {
    %c0_i32 = arith.constant 0 : i32
    %c0_i32_0 = arith.constant 0 : i32
    return %arg0, %c0_i32 : i32, i32
  }
  func.func @transform_1(%arg0: i32) -> (i32, i32) {
    %c0_i32 = arith.constant 0 : i32
    %c0_i32_0 = arith.constant 0 : i32
    %c0_i32_1 = arith.constant 0 : i32
    return %c0_i32, %c0_i32_0 : i32, i32
  }
  func.func @transform_2(%arg0: i32) -> (i32, i32) {
    %c0_i32 = arith.constant 0 : i32
    %c0_i32_0 = arith.constant 0 : i32
    %c0_i32_1 = arith.constant 0 : i32
    return %c0_i32, %c0_i32_0 : i32, i32
  }
}

module attributes {stable_mosaic.version = 11 : i64} {
  func.func @_matmul_affine_relu_kernel(%arg0: i32, %arg1: i32, %arg2: memref<32x64xbf16, #tpu.memory_space<vmem>>, %arg3: memref<64x64xbf16, #tpu.memory_space<vmem>>, %arg4: memref<1x64xf32, #tpu.memory_space<vmem>>, %arg5: memref<1x64xf32, #tpu.memory_space<vmem>>, %arg6: memref<32x64xbf16, #tpu.memory_space<vmem>>) attributes {dimension_semantics = [#tpu.dimension_semantics<parallel>, #tpu.dimension_semantics<parallel>], iteration_bounds = array<i64: 1, 1>, scalar_prefetch = 0 : i64, scratch_operands = 0 : i64, tpu.core_type = #tpu.core_type<tc>, window_params = [{transform_indices = @transform_0, window_bounds = array<i64: 32, 64>}, {transform_indices = @transform_1, window_bounds = array<i64: 64, 64>}, {transform_indices = @transform_2, window_bounds = array<i64: 1, 64>}, {transform_indices = @transform_3, window_bounds = array<i64: 1, 64>}, {transform_indices = @transform_4, window_bounds = array<i64: 32, 64>}]} {
    %c0 = arith.constant 0 : index
    %c0_0 = arith.constant 0 : index
    %0 = vector.load %arg2[%c0, %c0_0] : memref<32x64xbf16, #tpu.memory_space<vmem>>, vector<32x64xbf16>
    %c0_1 = arith.constant 0 : index
    %c0_2 = arith.constant 0 : index
    %1 = vector.load %arg3[%c0_1, %c0_2] : memref<64x64xbf16, #tpu.memory_space<vmem>>, vector<64x64xbf16>
    %cst = arith.constant dense<0.000000e+00> : vector<32x64xf32>
    %2 = tpu.matmul %0, %1, %cst {dimension_numbers = #tpu.dot_dimension_numbers<[1], [0], [0], [1], [0, 0, 1, 1], [], []>} : vector<32x64xbf16>, vector<64x64xbf16>, vector<32x64xf32> -> vector<32x64xf32>
    %c0_3 = arith.constant 0 : index
    %c0_4 = arith.constant 0 : index
    %3 = vector.load %arg4[%c0_3, %c0_4] : memref<1x64xf32, #tpu.memory_space<vmem>>, vector<1x64xf32>
    %4 = vector.broadcast %3 : vector<1x64xf32> to vector<32x64xf32>
    %5 = arith.mulf %2, %4 : vector<32x64xf32>
    %c0_5 = arith.constant 0 : index
    %c0_6 = arith.constant 0 : index
    %6 = vector.load %arg5[%c0_5, %c0_6] : memref<1x64xf32, #tpu.memory_space<vmem>>, vector<1x64xf32>
    %7 = vector.broadcast %6 : vector<1x64xf32> to vector<32x64xf32>
    %8 = arith.addf %5, %7 : vector<32x64xf32>
    %cst_7 = arith.constant 0.000000e+00 : f32
    %9 = vector.broadcast %cst_7 : f32 to vector<32x64xf32>
    %10 = arith.maximumf %8, %9 : vector<32x64xf32>
    %11 = arith.truncf %10 : vector<32x64xf32> to vector<32x64xbf16>
    %c0_8 = arith.constant 0 : index
    %c0_9 = arith.constant 0 : index
    %12 = vector.load %arg6[%c0_8, %c0_9] : memref<32x64xbf16, #tpu.memory_space<vmem>>, vector<32x64xbf16>
    tpu.vector_store %arg6[%c0_8, %c0_9], %11 {strides = array<i32>} : memref<32x64xbf16, #tpu.memory_space<vmem>>, vector<32x64xbf16>,
    return
  }
  func.func @transform_0(%arg0: i32, %arg1: i32) -> (i32, i32) {
    %c0_i32 = arith.constant 0 : i32
    %c0_i32_0 = arith.constant 0 : i32
    return %arg0, %c0_i32 : i32, i32
  }
  func.func @transform_1(%arg0: i32, %arg1: i32) -> (i32, i32) {
    %c0_i32 = arith.constant 0 : i32
    %c0_i32_0 = arith.constant 0 : i32
    return %c0_i32, %arg1 : i32, i32
  }
  func.func @transform_2(%arg0: i32, %arg1: i32) -> (i32, i32) {
    %c0_i32 = arith.constant 0 : i32
    %c0_i32_0 = arith.constant 0 : i32
    return %c0_i32, %arg1 : i32, i32
  }
  func.func @transform_3(%arg0: i32, %arg1: i32) -> (i32, i32) {
    %c0_i32 = arith.constant 0 : i32
    %c0_i32_0 = arith.constant 0 : i32
    return %c0_i32, %arg1 : i32, i32
  }
  func.func @transform_4(%arg0: i32, %arg1: i32) -> (i32, i32) {
    %c0_i32 = arith.constant 0 : i32
    return %arg0, %arg1 : i32, i32
  }
}

module attributes {stable_mosaic.version = 11 : i64} {
  func.func @_matmul_affine_relu_kernel(%arg0: i32, %arg1: i32, %arg2: memref<32x64xbf16, #tpu.memory_space<vmem>>, %arg3: memref<64x128xbf16, #tpu.memory_space<vmem>>, %arg4: memref<1x128xf32, #tpu.memory_space<vmem>>, %arg5: memref<1x128xf32, #tpu.memory_space<vmem>>, %arg6: memref<32x128xbf16, #tpu.memory_space<vmem>>) attributes {dimension_semantics = [#tpu.dimension_semantics<parallel>, #tpu.dimension_semantics<parallel>], iteration_bounds = array<i64: 1, 1>, scalar_prefetch = 0 : i64, scratch_operands = 0 : i64, tpu.core_type = #tpu.core_type<tc>, window_params = [{transform_indices = @transform_0, window_bounds = array<i64: 32, 64>}, {transform_indices = @transform_1, window_bounds = array<i64: 64, 128>}, {transform_indices = @transform_2, window_bounds = array<i64: 1, 128>}, {transform_indices = @transform_3, window_bounds = array<i64: 1, 128>}, {transform_indices = @transform_4, window_bounds = array<i64: 32, 128>}]} {
    %c0 = arith.constant 0 : index
    %c0_0 = arith.constant 0 : index
    %0 = vector.load %arg2[%c0, %c0_0] : memref<32x64xbf16, #tpu.memory_space<vmem>>, vector<32x64xbf16>
    %c0_1 = arith.constant 0 : index
    %c0_2 = arith.constant 0 : index
    %1 = vector.load %arg3[%c0_1, %c0_2] : memref<64x128xbf16, #tpu.memory_space<vmem>>, vector<64x128xbf16>
    %cst = arith.constant dense<0.000000e+00> : vector<32x128xf32>
    %2 = tpu.matmul %0, %1, %cst {dimension_numbers = #tpu.dot_dimension_numbers<[1], [0], [0], [1], [0, 0, 1, 1], [], []>} : vector<32x64xbf16>, vector<64x128xbf16>, vector<32x128xf32> -> vector<32x128xf32>
    %c0_3 = arith.constant 0 : index
    %c0_4 = arith.constant 0 : index
    %3 = vector.load %arg4[%c0_3, %c0_4] : memref<1x128xf32, #tpu.memory_space<vmem>>, vector<1x128xf32>
    %4 = vector.broadcast %3 : vector<1x128xf32> to vector<32x128xf32>
    %5 = arith.mulf %2, %4 : vector<32x128xf32>
    %c0_5 = arith.constant 0 : index
    %c0_6 = arith.constant 0 : index
    %6 = vector.load %arg5[%c0_5, %c0_6] : memref<1x128xf32, #tpu.memory_space<vmem>>, vector<1x128xf32>
    %7 = vector.broadcast %6 : vector<1x128xf32> to vector<32x128xf32>
    %8 = arith.addf %5, %7 : vector<32x128xf32>
    %cst_7 = arith.constant 0.000000e+00 : f32
    %9 = vector.broadcast %cst_7 : f32 to vector<32x128xf32>
    %10 = arith.maximumf %8, %9 : vector<32x128xf32>
    %11 = arith.truncf %10 : vector<32x128xf32> to vector<32x128xbf16>
    %c0_8 = arith.constant 0 : index
    %c0_9 = arith.constant 0 : index
    %12 = vector.load %arg6[%c0_8, %c0_9] : memref<32x128xbf16, #tpu.memory_space<vmem>>, vector<32x128xbf16>
    tpu.vector_store %arg6[%c0_8, %c0_9], %11 {strides = array<i32>} : memref<32x128xbf16, #tpu.memory_space<vmem>>, vector<32x128xbf16>,
    return
  }
  func.func @transform_0(%arg0: i32, %arg1: i32) -> (i32, i32) {
    %c0_i32 = arith.constant 0 : i32
    %c0_i32_0 = arith.constant 0 : i32
    return %arg0, %c0_i32 : i32, i32
  }
  func.func @transform_1(%arg0: i32, %arg1: i32) -> (i32, i32) {
    %c0_i32 = arith.constant 0 : i32
    %c0_i32_0 = arith.constant 0 : i32
    return %c0_i32, %arg1 : i32, i32
  }
  func.func @transform_2(%arg0: i32, %arg1: i32) -> (i32, i32) {
    %c0_i32 = arith.constant 0 : i32
    %c0_i32_0 = arith.constant 0 : i32
    return %c0_i32, %arg1 : i32, i32
  }
  func.func @transform_3(%arg0: i32, %arg1: i32) -> (i32, i32) {
    %c0_i32 = arith.constant 0 : i32
    %c0_i32_0 = arith.constant 0 : i32
    return %c0_i32, %arg1 : i32, i32
  }
  func.func @transform_4(%arg0: i32, %arg1: i32) -> (i32, i32) {
    %c0_i32 = arith.constant 0 : i32
    return %arg0, %arg1 : i32, i32
  }
}

module attributes {stable_mosaic.version = 11 : i64} {
  func.func @_stats_kernel(%arg0: i32, %arg1: memref<32x128xbf16, #tpu.memory_space<vmem>>, %arg2: memref<1x128xf32, #tpu.memory_space<vmem>>, %arg3: memref<128x128xf32, #tpu.memory_space<vmem>>) attributes {dimension_semantics = [#tpu.dimension_semantics<arbitrary>], iteration_bounds = array<i64: 1>, scalar_prefetch = 0 : i64, scratch_operands = 0 : i64, tpu.core_type = #tpu.core_type<tc>, window_params = [{transform_indices = @transform_0, window_bounds = array<i64: 32, 128>}, {pipeline_mode = #tpu.pipeline_mode<synchronous>, transform_indices = @transform_1, window_bounds = array<i64: 1, 128>}, {pipeline_mode = #tpu.pipeline_mode<synchronous>, transform_indices = @transform_2, window_bounds = array<i64: 128, 128>}]} {
    %c0_i32 = arith.constant 0 : i32
    %0 = arith.cmpi eq, %arg0, %c0_i32 : i32
    %1 = arith.extui %0 : i1 to i32
    %c0_i32_0 = arith.constant 0 : i32
    %2 = arith.cmpi ne, %1, %c0_i32_0 : i32
    scf.if %2 {
      %cst_11 = arith.constant 0.000000e+00 : f32
      %14 = vector.broadcast %cst_11 : f32 to vector<1x128xf32>
      %c0_12 = arith.constant 0 : index
      %c0_13 = arith.constant 0 : index
      %15 = vector.load %arg2[%c0_12, %c0_13] : memref<1x128xf32, #tpu.memory_space<vmem>>, vector<1x128xf32>
      tpu.vector_store %arg2[%c0_12, %c0_13], %14 {strides = array<i32>} : memref<1x128xf32, #tpu.memory_space<vmem>>, vector<1x128xf32>,
      %cst_14 = arith.constant 0.000000e+00 : f32
      %16 = vector.broadcast %cst_14 : f32 to vector<128x128xf32>
      %c0_15 = arith.constant 0 : index
      %c0_16 = arith.constant 0 : index
      %17 = vector.load %arg3[%c0_15, %c0_16] : memref<128x128xf32, #tpu.memory_space<vmem>>, vector<128x128xf32>
      tpu.vector_store %arg3[%c0_15, %c0_16], %16 {strides = array<i32>} : memref<128x128xf32, #tpu.memory_space<vmem>>, vector<128x128xf32>,
    } else {
    }
    %c0 = arith.constant 0 : index
    %c0_1 = arith.constant 0 : index
    %3 = vector.load %arg1[%c0, %c0_1] : memref<32x128xbf16, #tpu.memory_space<vmem>>, vector<32x128xbf16>
    %4 = arith.extf %3 : vector<32x128xbf16> to vector<32x128xf32>
    %c0_2 = arith.constant 0 : index
    %c0_3 = arith.constant 0 : index
    %5 = vector.load %arg2[%c0_2, %c0_3] : memref<1x128xf32, #tpu.memory_space<vmem>>, vector<1x128xf32>
    %cst = arith.constant dense<0.000000e+00> : vector<128xf32>
    %6 = vector.multi_reduction <add>, %4, %cst [0] : vector<32x128xf32> to vector<128xf32>
    %7 = vector.shape_cast %6 : vector<128xf32> to vector<1x128xf32>
    %8 = arith.addf %5, %7 : vector<1x128xf32>
    %c0_4 = arith.constant 0 : index
    %c0_5 = arith.constant 0 : index
    %9 = vector.load %arg2[%c0_4, %c0_5] : memref<1x128xf32, #tpu.memory_space<vmem>>, vector<1x128xf32>
    tpu.vector_store %arg2[%c0_4, %c0_5], %8 {strides = array<i32>} : memref<1x128xf32, #tpu.memory_space<vmem>>, vector<1x128xf32>,
    %c0_6 = arith.constant 0 : index
    %c0_7 = arith.constant 0 : index
    %10 = vector.load %arg3[%c0_6, %c0_7] : memref<128x128xf32, #tpu.memory_space<vmem>>, vector<128x128xf32>
    %cst_8 = arith.constant dense<0.000000e+00> : vector<128x128xf32>
    %11 = tpu.matmul %4, %4, %cst_8 {dimension_numbers = #tpu.dot_dimension_numbers<[0], [0], [1], [1], [0, 1, 1, 1], [], []>} : vector<32x128xf32>, vector<32x128xf32>, vector<128x128xf32> -> vector<128x128xf32>
    %12 = arith.addf %10, %11 : vector<128x128xf32>
    %c0_9 = arith.constant 0 : index
    %c0_10 = arith.constant 0 : index
    %13 = vector.load %arg3[%c0_9, %c0_10] : memref<128x128xf32, #tpu.memory_space<vmem>>, vector<128x128xf32>
    tpu.vector_store %arg3[%c0_9, %c0_10], %12 {strides = array<i32>} : memref<128x128xf32, #tpu.memory_space<vmem>>, vector<128x128xf32>,
    return
  }
  func.func @transform_0(%arg0: i32) -> (i32, i32) {
    %c0_i32 = arith.constant 0 : i32
    %c0_i32_0 = arith.constant 0 : i32
    return %arg0, %c0_i32 : i32, i32
  }
  func.func @transform_1(%arg0: i32) -> (i32, i32) {
    %c0_i32 = arith.constant 0 : i32
    %c0_i32_0 = arith.constant 0 : i32
    %c0_i32_1 = arith.constant 0 : i32
    return %c0_i32, %c0_i32_0 : i32, i32
  }
  func.func @transform_2(%arg0: i32) -> (i32, i32) {
    %c0_i32 = arith.constant 0 : i32
    %c0_i32_0 = arith.constant 0 : i32
    %c0_i32_1 = arith.constant 0 : i32
    return %c0_i32, %c0_i32_0 : i32, i32
  }
}

module attributes {stable_mosaic.version = 11 : i64} {
  func.func @_matmul_affine_relu_kernel(%arg0: i32, %arg1: i32, %arg2: memref<32x128xbf16, #tpu.memory_space<vmem>>, %arg3: memref<128x512xbf16, #tpu.memory_space<vmem>>, %arg4: memref<1x512xf32, #tpu.memory_space<vmem>>, %arg5: memref<1x512xf32, #tpu.memory_space<vmem>>, %arg6: memref<32x512xbf16, #tpu.memory_space<vmem>>) attributes {dimension_semantics = [#tpu.dimension_semantics<parallel>, #tpu.dimension_semantics<parallel>], iteration_bounds = array<i64: 1, 2>, scalar_prefetch = 0 : i64, scratch_operands = 0 : i64, tpu.core_type = #tpu.core_type<tc>, window_params = [{transform_indices = @transform_0, window_bounds = array<i64: 32, 128>}, {transform_indices = @transform_1, window_bounds = array<i64: 128, 512>}, {transform_indices = @transform_2, window_bounds = array<i64: 1, 512>}, {transform_indices = @transform_3, window_bounds = array<i64: 1, 512>}, {transform_indices = @transform_4, window_bounds = array<i64: 32, 512>}]} {
    %c0 = arith.constant 0 : index
    %c0_0 = arith.constant 0 : index
    %0 = vector.load %arg2[%c0, %c0_0] : memref<32x128xbf16, #tpu.memory_space<vmem>>, vector<32x128xbf16>
    %c0_1 = arith.constant 0 : index
    %c0_2 = arith.constant 0 : index
    %1 = vector.load %arg3[%c0_1, %c0_2] : memref<128x512xbf16, #tpu.memory_space<vmem>>, vector<128x512xbf16>
    %cst = arith.constant dense<0.000000e+00> : vector<32x512xf32>
    %2 = tpu.matmul %0, %1, %cst {dimension_numbers = #tpu.dot_dimension_numbers<[1], [0], [0], [1], [0, 0, 1, 1], [], []>} : vector<32x128xbf16>, vector<128x512xbf16>, vector<32x512xf32> -> vector<32x512xf32>
    %c0_3 = arith.constant 0 : index
    %c0_4 = arith.constant 0 : index
    %3 = vector.load %arg4[%c0_3, %c0_4] : memref<1x512xf32, #tpu.memory_space<vmem>>, vector<1x512xf32>
    %4 = vector.broadcast %3 : vector<1x512xf32> to vector<32x512xf32>
    %5 = arith.mulf %2, %4 : vector<32x512xf32>
    %c0_5 = arith.constant 0 : index
    %c0_6 = arith.constant 0 : index
    %6 = vector.load %arg5[%c0_5, %c0_6] : memref<1x512xf32, #tpu.memory_space<vmem>>, vector<1x512xf32>
    %7 = vector.broadcast %6 : vector<1x512xf32> to vector<32x512xf32>
    %8 = arith.addf %5, %7 : vector<32x512xf32>
    %cst_7 = arith.constant 0.000000e+00 : f32
    %9 = vector.broadcast %cst_7 : f32 to vector<32x512xf32>
    %10 = arith.maximumf %8, %9 : vector<32x512xf32>
    %11 = arith.truncf %10 : vector<32x512xf32> to vector<32x512xbf16>
    %c0_8 = arith.constant 0 : index
    %c0_9 = arith.constant 0 : index
    %12 = vector.load %arg6[%c0_8, %c0_9] : memref<32x512xbf16, #tpu.memory_space<vmem>>, vector<32x512xbf16>
    tpu.vector_store %arg6[%c0_8, %c0_9], %11 {strides = array<i32>} : memref<32x512xbf16, #tpu.memory_space<vmem>>, vector<32x512xbf16>,
    return
  }
  func.func @transform_0(%arg0: i32, %arg1: i32) -> (i32, i32) {
    %c0_i32 = arith.constant 0 : i32
    %c0_i32_0 = arith.constant 0 : i32
    return %arg0, %c0_i32 : i32, i32
  }
  func.func @transform_1(%arg0: i32, %arg1: i32) -> (i32, i32) {
    %c0_i32 = arith.constant 0 : i32
    %c0_i32_0 = arith.constant 0 : i32
    return %c0_i32, %arg1 : i32, i32
  }
  func.func @transform_2(%arg0: i32, %arg1: i32) -> (i32, i32) {
    %c0_i32 = arith.constant 0 : i32
    %c0_i32_0 = arith.constant 0 : i32
    return %c0_i32, %arg1 : i32, i32
  }
  func.func @transform_3(%arg0: i32, %arg1: i32) -> (i32, i32) {
    %c0_i32 = arith.constant 0 : i32
    %c0_i32_0 = arith.constant 0 : i32
    return %c0_i32, %arg1 : i32, i32
  }
  func.func @transform_4(%arg0: i32, %arg1: i32) -> (i32, i32) {
    %c0_i32 = arith.constant 0 : i32
    return %arg0, %arg1 : i32, i32
  }
}

module attributes {stable_mosaic.version = 11 : i64} {
  func.func @_fix_pool_kernel(%arg0: i32, %arg1: memref<2x16x1024xbf16, #tpu.memory_space<vmem>>, %arg2: memref<2x1x1024xf32, #tpu.memory_space<vmem>>) attributes {dimension_semantics = [#tpu.dimension_semantics<parallel>], iteration_bounds = array<i64: 1>, scalar_prefetch = 0 : i64, scratch_operands = 0 : i64, tpu.core_type = #tpu.core_type<tc>, window_params = [{transform_indices = @transform_0, window_bounds = array<i64: 2, 16, 1024>}, {transform_indices = @transform_1, window_bounds = array<i64: 2, 1, 1024>}]} {
    %c0 = arith.constant 0 : index
    %c0_0 = arith.constant 0 : index
    %c0_1 = arith.constant 0 : index
    %0 = vector.load %arg1[%c0, %c0_0, %c0_1] : memref<2x16x1024xbf16, #tpu.memory_space<vmem>>, vector<2x16x1024xbf16>
    %1 = arith.extf %0 : vector<2x16x1024xbf16> to vector<2x16x1024xf32>
    %cst = arith.constant dense<0xFF800000> : vector<2x1024xf32>
    %2 = vector.multi_reduction <maximumf>, %1, %cst [1] : vector<2x16x1024xf32> to vector<2x1024xf32>
    %3 = vector.shape_cast %2 : vector<2x1024xf32> to vector<2x1x1024xf32>
    %4 = vector.broadcast %3 : vector<2x1x1024xf32> to vector<2x16x1024xf32>
    %5 = arith.subf %1, %4 : vector<2x16x1024xf32>
    %6 = arith.mulf %5, %5 : vector<2x16x1024xf32>
    %cst_2 = arith.constant dense<0.000000e+00> : vector<2x16xf32>
    %7 = vector.multi_reduction <add>, %6, %cst_2 [2] : vector<2x16x1024xf32> to vector<2x16xf32>
    %8 = vector.shape_cast %7 : vector<2x16xf32> to vector<2x16x1xf32>
    %9 = math.sqrt %8 : vector<2x16x1xf32>
    %cst_3 = arith.constant dense<0xFF800000> : vector<2x1xf32>
    %10 = vector.multi_reduction <maximumf>, %9, %cst_3 [1] : vector<2x16x1xf32> to vector<2x1xf32>
    %11 = vector.shape_cast %10 : vector<2x1xf32> to vector<2x1x1xf32>
    %12 = vector.broadcast %11 : vector<2x1x1xf32> to vector<2x16x1xf32>
    %13 = arith.subf %9, %12 : vector<2x16x1xf32>
    %14 = math.exp %13 : vector<2x16x1xf32>
    %cst_4 = arith.constant dense<0.000000e+00> : vector<2x1xf32>
    %15 = vector.multi_reduction <add>, %14, %cst_4 [1] : vector<2x16x1xf32> to vector<2x1xf32>
    %16 = vector.shape_cast %15 : vector<2x1xf32> to vector<2x1x1xf32>
    %17 = tpu.reciprocal %16 {approx = true} : vector<2x1x1xf32> -> vector<2x1x1xf32>
    %18 = vector.broadcast %17 : vector<2x1x1xf32> to vector<2x16x1xf32>
    %19 = arith.mulf %14, %18 : vector<2x16x1xf32>
    %cst_5 = arith.constant 1.000000e+00 : f32
    %20 = vector.broadcast %cst_5 : f32 to vector<2x16x1xf32>
    %21 = arith.subf %20, %19 : vector<2x16x1xf32>
    %22 = vector.broadcast %21 : vector<2x16x1xf32> to vector<2x16x1024xf32>
    %23 = arith.mulf %1, %22 : vector<2x16x1024xf32>
    %cst_6 = arith.constant dense<0xFF800000> : vector<2x1024xf32>
    %24 = vector.multi_reduction <maximumf>, %23, %cst_6 [1] : vector<2x16x1024xf32> to vector<2x1024xf32>
    %25 = vector.shape_cast %24 : vector<2x1024xf32> to vector<2x1x1024xf32>
    %c0_7 = arith.constant 0 : index
    %c0_8 = arith.constant 0 : index
    %c0_9 = arith.constant 0 : index
    %26 = vector.load %arg2[%c0_7, %c0_8, %c0_9] : memref<2x1x1024xf32, #tpu.memory_space<vmem>>, vector<2x1x1024xf32>
    tpu.vector_store %arg2[%c0_7, %c0_8, %c0_9], %25 {strides = array<i32>} : memref<2x1x1024xf32, #tpu.memory_space<vmem>>, vector<2x1x1024xf32>,
    return
  }
  func.func @transform_0(%arg0: i32) -> (i32, i32, i32) {
    %c0_i32 = arith.constant 0 : i32
    %c0_i32_0 = arith.constant 0 : i32
    %c0_i32_1 = arith.constant 0 : i32
    return %arg0, %c0_i32, %c0_i32_0 : i32, i32, i32
  }
  func.func @transform_1(%arg0: i32) -> (i32, i32, i32) {
    %c0_i32 = arith.constant 0 : i32
    %c0_i32_0 = arith.constant 0 : i32
    %c0_i32_1 = arith.constant 0 : i32
    return %arg0, %c0_i32, %c0_i32_0 : i32, i32, i32
  }
}

</mosaic_0001>

<bundles_post_ra>
// kernel: pointnet_features.11
= control target key start
LH: loop header
LB: loop body
LE: loop exit
PB: predicated region body
PF: predicated region fallthrough
CT: control target
= control target key end

     0   :  { %vm14_vm0 = vcmask 57344   ;;  %vm16_vm1 = vcmask 64512   ;;  %v189_v2 = vmov 0.0   ;;  %vm190_vm2 = vmmov 0   ;;  %s238_s0 = inlined_call_operand.vmem [shape: bf16[32,8], index: 0, kind: input, shape index: {}]   ;;  %s239_s1 = inlined_call_operand.vmem [shape: f32[1,8], index: 1, kind: output, shape index: {0}]   ;;  %s240_s2 = inlined_call_operand.vmem [shape: f32[8,8], index: 2, kind: output, shape index: {1}]  }
   0x1   :  { %v163_v0 = vld [vmem:[%s238_s0] sm:$0xff]   ;;  %v170_v1 = vld [vmem:[%s238_s0 + $0x8] sm:$0xff]   ;;  %15 = vst.msk [vmem:[%s239_s1] sm:$0x1] %vm14_vm0, %v189_v2  ;;  %176 = vmatprep.subr.mxu0 %v189_v2  ;;  %184 = vmatprep.mubr.msk.f32.mxu0 %vm190_vm2, %v189_v2  ;;  %vm77_vm3 = vcmask 261120  }
   0x2   :  { %v164_v3 = vunpack.c.l.bf16 %v163_v0  ;;  %v165_v4 = vunpack.c.h.bf16 %v163_v0  ;;  %v168_v5 = vunpack.c.l.bf16 %v170_v1  ;;  %v169_v6 = vunpack.c.h.bf16 %v170_v1  ;;  %17 = vst.msk [vmem:[%s240_s2] sm:$0xff] %vm16_vm1, %v189_v2 }
   0x4   :  { %45 = vxpose.xlu0.b32.start [1/4] (short) (narrow) %v164_v3, 8  ;;  %v28_v7 = vsel %vm16_vm1, %v164_v3, 0.0  ;;  %v29_v8 = vsel %vm16_vm1, %v165_v4, 0.0  ;;  %v31_v9 = vsel %vm16_vm1, %v168_v5, 0.0  ;;  %177 = vmatpush3.msra.mxu0 %v169_v6  ;;  %v33_v11 = vsel %vm16_vm1, %v169_v6, 0.0 }
   0x5   :  { %v30_v10 = vadd.f32 %v29_v8, %v28_v7  ;;  %178 = vmatprep.subr.mxu0 %v189_v2 }
   0x6   :  { %179 = vmatpush3.msra.mxu0 %v168_v5 }
   0x7   :  { %v32_v12 = vadd.f32 %v31_v9, %v30_v10  ;;  %180 = vmatprep.subr.mxu0 %v189_v2 }
   0x8   :  { %46 = vxpose.xlu0.b32.cont [2/4] (short) (narrow) %v165_v4, 8  ;;  %181 = vmatpush3.msra.mxu0 %v165_v4  ;;  %v26_v19 = vld [vmem:[%s239_s1] sm:$0x1] }
   0x9   :  { %v34_v13 = vadd.f32 %v33_v11, %v32_v12  ;;  %182 = vmatprep.subr.mxu0 %v189_v2  ;;  %v44_v23 = vld [vmem:[%s240_s2] sm:$0xff] }
   0xa   :  { %183 = vmatpush3.msra.mxu0 %v164_v3 }
   0xb   :  { %v35_v14 = vrot.slane %v34_v13, 4 }
   0xc   :  { %47 = vxpose.xlu0.b32.cont [3/4] (short) (narrow) %v168_v5, 8 }
   0xd   :  { %v36_v15 = vadd.f32 %v35_v14, %v34_v13 }
   0xf   :  { %v37_v16 = vrot.slane %v36_v15, 2 }
  0x10   :  { %48 = vxpose.xlu0.b32.end [4/4] (short) (narrow) %v169_v6, 8 }
  0x11   :  { %v38_v17 = vadd.f32 %v37_v16, %v36_v15 }
  0x13   :  { %v39_v18 = vrot.slane %v38_v17, 1 }
  0x15   :  { %v40_v20 = vadd.f32 %v39_v18, %v38_v17 }
  0x17   :  { %v41_v21 = vadd.f32 %v40_v20, %v26_v19 }
  0x19   :  { %43 = vst.msk [vmem:[%s239_s1] sm:$0x1] %vm14_vm0, %v41_v21 }
  0x80   :  { %v61_v22 = vpop.trf.xlu0 }
  0x81   :  { %185 = vmatmul.mubr.msk.f32.vlgmr.msra.gmra.mxu0 %vm77_vm3, %v61_v22 }
 0x141   :  { %v147_v24 = vpop.f32.mrf.mxu0 }
 0x142   :  { %v151_v25 = vadd.f32 %v147_v24, %v44_v23 }
 0x143   :  { %v186_v26 = vpop.f32.mrf.mxu0 }
 0x144   :  { %152 = vst.msk [vmem:[%s240_s2] sm:$0xff] %vm16_vm1, %v151_v25 }

// kernel: pointnet_features.12
= control target key start
LH: loop header
LB: loop body
LE: loop exit
PB: predicated region body
PF: predicated region fallthrough
CT: control target
= control target key end

     0   :  { %vm40_vm0 = vcmask 1043456   ;;  %vm33_vm1 = vcmask 64512   ;;  %vm135_vm2 = vcmask 519168   ;;  %s222_s1 = inlined_call_operand.vmem [shape: bf16[8,64], index: 1, kind: input, shape index: {}]   ;;  %s223_s0 = inlined_call_operand.vmem [shape: bf16[32,8], index: 0, kind: input, shape index: {}]   ;;  %s224_s2 = inlined_call_operand.vmem [shape: f32[1,64], index: 2, kind: input, shape index: {}]   ;;  %s225_s3 = inlined_call_operand.vmem [shape: f32[1,64], index: 3, kind: input, shape index: {}]   ;;  %s226_s4 = inlined_call_operand.vmem [shape: bf16[32,64], index: 4, kind: output, shape index: {}]  }
   0x1   :  { %v22_v0 = vld [vmem:[%s222_s1] sm:$0xf]  ;;  %v169_v3 = vld [vmem:[%s223_s0 + $0x8] sm:$0xff]  }
   0x2   :  { %167 = vmatprep.subr.msk.bf16.mxu0 %vm40_vm0, %v22_v0  ;;  %v42_v1 = vsel %vm40_vm0, %v22_v0, 0  ;;  %v168_v2 = vld [vmem:[%s223_s0] sm:$0xff]  }
   0x3   :  { %162 = vmatpush3.bf16.msra.mxu0 %v42_v1  ;;  %163 = vmatprep.mubr.msk.bf16.mxu0 %vm33_vm1, %v168_v2  ;;  %v148_v4 = vld [vmem:[%s224_s2] ss:$0 sm:$0xff] }
   0x4   :  { %v149_v6 = vld [vmem:[%s225_s3] ss:$0 sm:$0xff] }
   0x6   :  { %164 = vmatmul.mubr.msk.bf16.vlgmr.msra.gmra.mxu0 %vm33_vm1, %v169_v3 }
  0xc6   :  { %v165_v5 = vpop.f32.mrf.mxu0 }
  0xc7   :  { %v102_v7 = vmul.f32 %v165_v5, %v148_v4 }
  0xc8   :  { %v78_v8 = vpop.f32.mrf.mxu0 }
  0xc9   :  { %v113_v9 = vadd.f32 %v149_v6, %v102_v7  ;;  %v100_v10 = vmul.f32 %v148_v4, %v78_v8 }
  0xca   :  { %v166_v11 = vpop.f32.mrf.mxu0 }
  0xcb   :  { %v117_v12 = vmax.f32 %v113_v9, 0.0  ;;  %v111_v13 = vadd.f32 %v149_v6, %v100_v10  ;;  %v103_v14 = vmul.f32 %v166_v11, %v148_v4 }
  0xcc   :  { %v81_v15 = vpop.f32.mrf.mxu0 }
  0xcd   :  { %v156_v16 = vpack.c.bf16 %v117_v12, %v117_v12  ;;  %v115_v17 = vmax.f32 %v111_v13, 0.0  ;;  %v114_v18 = vadd.f32 %v149_v6, %v103_v14  ;;  %v101_v19 = vmul.f32 %v148_v4, %v81_v15 }
  0xcf   :  { %138 = vst.msk [vmem:[%s226_s4 + $0x8] sm:$0xf] %vm135_vm2, %v156_v16  ;;  %v154_v20 = vpack.c.bf16 %v115_v17, %v115_v17  ;;  %v118_v21 = vmax.f32 %v114_v18, 0.0  ;;  %v112_v22 = vadd.f32 %v149_v6, %v101_v19 }
  0xd1   :  { %136 = vst.msk [vmem:[%s226_s4] sm:$0xf] %vm135_vm2, %v154_v20  ;;  %v157_v23 = vpack.c.bf16 %v118_v21, %v118_v21  ;;  %v116_v24 = vmax.f32 %v112_v22, 0.0 }
  0xd3   :  { %139 = vst.msk [vmem:[%s226_s4 + $0xc] sm:$0xf] %vm135_vm2, %v157_v23  ;;  %v155_v25 = vpack.c.bf16 %v116_v24, %v116_v24 }
  0xd5   :  { %137 = vst.msk [vmem:[%s226_s4 + $0x4] sm:$0xf] %vm135_vm2, %v155_v25 }

// kernel: pointnet_features.13
= control target key start
LH: loop header
LB: loop body
LE: loop exit
PB: predicated region body
PF: predicated region fallthrough
CT: control target
= control target key end

     0   :  { %vm16_vm0 = vcmask 523264   ;;  %vm14_vm1 = vcmask 516096   ;;  %v303_v18 = vmov 0.0   ;;  %vm91_vm2 = vcmask 261120   ;;  %s434_s0 = inlined_call_operand.vmem [shape: bf16[32,64], index: 0, kind: input, shape index: {}]   ;;  %s435_s1 = inlined_call_operand.vmem [shape: f32[1,64], index: 1, kind: output, shape index: {0}]   ;;  %s436_s2 = inlined_call_operand.vmem [shape: f32[64,64], index: 2, kind: output, shape index: {1}]  }
   0x1   :  { %v254_v0 = vld [vmem:[%s434_s0] sm:$0xff]   ;;  %v261_v1 = vld [vmem:[%s434_s0 + $0x8] sm:$0xff]   ;;  %15 = vst.msk [vmem:[%s435_s1] sm:$0x1] %vm14_vm1, %v303_v18 }
   0x2   :  { %v255_v2 = vunpack.c.l.bf16 %v254_v0  ;;  %v256_v3 = vunpack.c.h.bf16 %v254_v0  ;;  %v259_v4 = vunpack.c.l.bf16 %v261_v1  ;;  %v260_v5 = vunpack.c.h.bf16 %v261_v1  ;;  %18 = vst.msk [vmem:[%s436_s2 + $0x8] sm:$0xff] %vm16_vm0, %v303_v18  ;;  %17 = vst.msk [vmem:[%s436_s2] sm:$0xff] %vm16_vm0, %v303_v18 }
   0x3   :  { %19 = vst.msk [vmem:[%s436_s2 + $0x10] sm:$0xff] %vm16_vm0, %v303_v18  ;;  %20 = vst.msk [vmem:[%s436_s2 + $0x18] sm:$0xff] %vm16_vm0, %v303_v18 }
   0x4   :  { %59 = vxpose.xlu0.b32.start [1/4] (short) (narrow) %v255_v2, 64  ;;  %v35_v6 = vsel %vm16_vm0, %v255_v2, 0.0  ;;  %v36_v7 = vsel %vm16_vm0, %v256_v3, 0.0  ;;  %v38_v8 = vsel %vm16_vm0, %v259_v4, 0.0  ;;  %274 = vmatprep.subr.mxu0 %v260_v5  ;;  %v40_v11 = vsel %vm16_vm0, %v260_v5, 0.0  ;;  %21 = vst.msk [vmem:[%s436_s2 + $0x20] sm:$0xff] %vm16_vm0, %v303_v18 }
   0x5   :  { %v37_v9 = vadd.f32 %v36_v7, %v35_v6  ;;  %275 = vmatpush3.msra.mxu0 %v260_v5  ;;  %294 = vmatprep.subr.mxu1 %v260_v5  ;;  %22 = vst.msk [vmem:[%s436_s2 + $0x28] sm:$0xff] %vm16_vm0, %v303_v18  ;;  %23 = vst.msk [vmem:[%s436_s2 + $0x30] sm:$0xff] %vm16_vm0, %v303_v18 }
   0x6   :  { %276 = vmatprep.subr.mxu0 %v259_v4  ;;  %298 = vmatpush3.msra.mxu1 %v260_v5  ;;  %24 = vst.msk [vmem:[%s436_s2 + $0x38] sm:$0xff] %vm16_vm0, %v303_v18 }
   0x7   :  { %v39_v10 = vadd.f32 %v38_v8, %v37_v9  ;;  %277 = vmatpush3.msra.mxu0 %v259_v4  ;;  %295 = vmatprep.subr.mxu1 %v259_v4 }
   0x8   :  { %60 = vxpose.xlu0.b32.cont [2/4] (short) (narrow) %v256_v3, 64  ;;  %278 = vmatprep.subr.mxu0 %v256_v3  ;;  %v33_v20 = vld [vmem:[%s435_s1] sm:$0x1] }
   0x9   :  { %279 = vmatpush3.msra.mxu0 %v256_v3  ;;  %299 = vmatpush3.msra.mxu1 %v259_v4  ;;  %v41_v12 = vadd.f32 %v40_v11, %v39_v10  ;;  %v52_v30 = vld [vmem:[%s436_s2 + $0x8] sm:$0xff]  ;;  %v51_v32 = vld [vmem:[%s436_s2] sm:$0xff] }
   0xa   :  { %280 = vmatprep.subr.mxu0 %v255_v2  ;;  %296 = vmatprep.subr.mxu1 %v256_v3  ;;  %v54_v36 = vld [vmem:[%s436_s2 + $0x18] sm:$0xff]  ;;  %v53_v38 = vld [vmem:[%s436_s2 + $0x10] sm:$0xff] }
   0xb   :  { %281 = vmatpush3.msra.mxu0 %v255_v2  ;;  %300 = vmatpush3.msra.mxu1 %v256_v3  ;;  %v42_v13 = vrot.slane %v41_v12, 4  ;;  %v55_v44 = vld [vmem:[%s436_s2 + $0x20] sm:$0xff] }
   0xc   :  { %61 = vxpose.xlu0.b32.cont [3/4] (short) (narrow) %v259_v4, 64  ;;  %297 = vmatprep.subr.mxu1 %v255_v2  ;;  %v56_v42 = vld [vmem:[%s436_s2 + $0x28] sm:$0xff]  ;;  %v57_v50 = vld [vmem:[%s436_s2 + $0x30] sm:$0xff] }
   0xd   :  { %301 = vmatpush3.msra.mxu1 %v255_v2  ;;  %v43_v14 = vadd.f32 %v42_v13, %v41_v12  ;;  %v58_v48 = vld [vmem:[%s436_s2 + $0x38] sm:$0xff] }
   0xf   :  { %v44_v15 = vrot.slane %v43_v14, 2 }
  0x10   :  { %62 = vxpose.xlu0.b32.end [4/4] (short) (narrow) %v260_v5, 64 }
  0x11   :  { %v45_v16 = vadd.f32 %v44_v15, %v43_v14 }
  0x13   :  { %v46_v17 = vrot.slane %v45_v16, 1 }
  0x15   :  { %v47_v19 = vadd.f32 %v46_v17, %v45_v16 }
  0x17   :  { %v48_v21 = vadd.f32 %v47_v19, %v33_v20 }
  0x19   :  { %50 = vst.msk [vmem:[%s435_s1] sm:$0x1] %vm14_vm1, %v48_v21 }
  0x80   :  { %v75_v22 = vpop.trf.xlu0 }
  0x81   :  { %282 = vmatprep.mubr.msk.f32.mxu0 %vm91_vm2, %v75_v22 }
  0x84   :  { %v76_v23 = vpop.trf.xlu0 }
  0x85   :  { %283 = vmatmul.mubr.msk.f32.vlgmr.msra.gmra.mxu0 %vm91_vm2, %v76_v23 }
  0x88   :  { %v77_v24 = vpop.trf.xlu0 }
  0x89   :  { %285 = vmatprep.mubr.msk.f32.mxu0 %vm91_vm2, %v77_v24 }
  0x8c   :  { %v78_v25 = vpop.trf.xlu0 }
  0x8d   :  { %286 = vmatmul.mubr.msk.f32.gmra.mxu0 %vm91_vm2, %v78_v25 }
  0x90   :  { %v79_v26 = vpop.trf.xlu0 }
  0x91   :  { %288 = vmatprep.mubr.msk.f32.mxu1 %vm91_vm2, %v79_v26 }
  0x94   :  { %v80_v27 = vpop.trf.xlu0 }
  0x95   :  { %289 = vmatmul.mubr.msk.f32.vlgmr.msra.gmra.mxu1 %vm91_vm2, %v80_v27 }
  0x98   :  { %v81_v28 = vpop.trf.xlu0 }
  0x99   :  { %291 = vmatprep.mubr.msk.f32.mxu1 %vm91_vm2, %v81_v28 }
  0x9c   :  { %v82_v29 = vpop.trf.xlu0 }
  0x9d   :  { %292 = vmatmul.mubr.msk.f32.gmra.mxu1 %vm91_vm2, %v82_v29 }
 0x145   :  { %v284_v31 = vpop.f32.mrf.mxu0 }
 0x146   :  { %v222_v33 = vadd.f32 %v284_v31, %v52_v30 }
 0x147   :  { %v182_v34 = vpop.f32.mrf.mxu0 }
 0x148   :  { %230 = vst.msk [vmem:[%s436_s2 + $0x8] sm:$0xff] %vm16_vm0, %v222_v33  ;;  %v221_v35 = vadd.f32 %v182_v34, %v51_v32 }
 0x14a   :  { %229 = vst.msk [vmem:[%s436_s2] sm:$0xff] %vm16_vm0, %v221_v35 }
 0x14d   :  { %v287_v37 = vpop.f32.mrf.mxu0 }
 0x14e   :  { %v224_v39 = vadd.f32 %v287_v37, %v54_v36 }
 0x14f   :  { %v192_v40 = vpop.f32.mrf.mxu0 }
 0x150   :  { %232 = vst.msk [vmem:[%s436_s2 + $0x18] sm:$0xff] %vm16_vm0, %v224_v39  ;;  %v223_v41 = vadd.f32 %v192_v40, %v53_v38 }
 0x152   :  { %231 = vst.msk [vmem:[%s436_s2 + $0x10] sm:$0xff] %vm16_vm0, %v223_v41 }
 0x155   :  { %v290_v43 = vpop.f32.mrf.mxu1 }
 0x156   :  { %v226_v45 = vadd.f32 %v290_v43, %v56_v42 }
 0x157   :  { %v202_v46 = vpop.f32.mrf.mxu1 }
 0x158   :  { %234 = vst.msk [vmem:[%s436_s2 + $0x28] sm:$0xff] %vm16_vm0, %v226_v45  ;;  %v225_v47 = vadd.f32 %v202_v46, %v55_v44 }
 0x15a   :  { %233 = vst.msk [vmem:[%s436_s2 + $0x20] sm:$0xff] %vm16_vm0, %v225_v47 }
 0x15d   :  { %v293_v49 = vpop.f32.mrf.mxu1 }
 0x15e   :  { %v228_v51 = vadd.f32 %v293_v49, %v58_v48 }
 0x15f   :  { %v212_v52 = vpop.f32.mrf.mxu1 }
 0x160   :  { %236 = vst.msk [vmem:[%s436_s2 + $0x38] sm:$0xff] %vm16_vm0, %v228_v51  ;;  %v227_v53 = vadd.f32 %v212_v52, %v57_v50 }
 0x162   :  { %235 = vst.msk [vmem:[%s436_s2 + $0x30] sm:$0xff] %vm16_vm0, %v227_v53 }

// kernel: pointnet_features.14
= control target key start
LH: loop header
LB: loop body
LE: loop exit
PB: predicated region body
PF: predicated region fallthrough
CT: control target
= control target key end

     0   :  { %vm64_vm0 = vcmask 523264   ;;  %vm162_vm1 = vcmask 519168   ;;  %s274_s1 = inlined_call_operand.vmem [shape: bf16[64,64], index: 1, kind: input, shape index: {}]   ;;  %s275_s0 = inlined_call_operand.vmem [shape: bf16[32,64], index: 0, kind: input, shape index: {}]   ;;  %s276_s2 = inlined_call_operand.vmem [shape: f32[1,64], index: 2, kind: input, shape index: {}]   ;;  %s277_s3 = inlined_call_operand.vmem [shape: f32[1,64], index: 3, kind: input, shape index: {}]   ;;  %s278_s4 = inlined_call_operand.vmem [shape: bf16[32,64], index: 4, kind: output, shape index: {}]  }
   0x1   :  { %v207_v0 = vld [vmem:[%s274_s1 + $0x18] sm:$0xff]   ;;  %v208_v1 = vld [vmem:[%s274_s1 + $0x10] sm:$0xff]   ;;  %v209_v2 = vld [vmem:[%s274_s1 + $0x8] sm:$0xff]  }
   0x2   :  { %195 = vmatprep.subr.bf16.mxu0 %v207_v0  ;;  %v211_v3 = vld [vmem:[%s275_s0] sm:$0xff]   ;;  %v212_v5 = vld [vmem:[%s275_s0 + $0x8] sm:$0xff]  }
   0x3   :  { %196 = vmatpush3.bf16.msra.mxu0 %v207_v0  ;;  %203 = vmatprep.mubr.msk.bf16.mxu0 %vm64_vm0, %v211_v3  ;;  %v210_v4 = vld [vmem:[%s274_s1] sm:$0xff]  }
   0x4   :  { %197 = vmatprep.subr.bf16.mxu0 %v208_v1  ;;  %v179_v6 = vld [vmem:[%s276_s2] ss:$0 sm:$0xff] }
   0x5   :  { %v180_v8 = vld [vmem:[%s277_s3] ss:$0 sm:$0xff] }
   0x7   :  { %198 = vmatpush3.bf16.msra.mxu0 %v208_v1 }
   0x8   :  { %199 = vmatprep.subr.bf16.mxu0 %v209_v2 }
   0xb   :  { %200 = vmatpush3.bf16.msra.mxu0 %v209_v2 }
   0xc   :  { %201 = vmatprep.subr.bf16.mxu0 %v210_v4 }
   0xf   :  { %202 = vmatpush3.bf16.msra.mxu0 %v210_v4 }
  0x12   :  { %204 = vmatmul.mubr.msk.bf16.vlgmr.msra.gmra.mxu0 %vm64_vm0, %v212_v5 }
  0xd2   :  { %v205_v7 = vpop.f32.mrf.mxu0 }
  0xd3   :  { %v129_v9 = vmul.f32 %v205_v7, %v179_v6 }
  0xd4   :  { %v105_v10 = vpop.f32.mrf.mxu0 }
  0xd5   :  { %v140_v11 = vadd.f32 %v180_v8, %v129_v9  ;;  %v127_v12 = vmul.f32 %v179_v6, %v105_v10 }
  0xd6   :  { %v206_v13 = vpop.f32.mrf.mxu0 }
  0xd7   :  { %v144_v14 = vmax.f32 %v140_v11, 0.0  ;;  %v138_v15 = vadd.f32 %v180_v8, %v127_v12  ;;  %v130_v16 = vmul.f32 %v206_v13, %v179_v6 }
  0xd8   :  { %v108_v17 = vpop.f32.mrf.mxu0 }
  0xd9   :  { %v187_v18 = vpack.c.bf16 %v144_v14, %v144_v14  ;;  %v142_v19 = vmax.f32 %v138_v15, 0.0  ;;  %v141_v20 = vadd.f32 %v180_v8, %v130_v16  ;;  %v128_v21 = vmul.f32 %v179_v6, %v108_v17 }
  0xdb   :  { %165 = vst.msk [vmem:[%s278_s4 + $0x8] sm:$0xf] %vm162_vm1, %v187_v18  ;;  %v185_v22 = vpack.c.bf16 %v142_v19, %v142_v19  ;;  %v145_v23 = vmax.f32 %v141_v20, 0.0  ;;  %v139_v24 = vadd.f32 %v180_v8, %v128_v21 }
  0xdd   :  { %163 = vst.msk [vmem:[%s278_s4] sm:$0xf] %vm162_vm1, %v185_v22  ;;  %v188_v25 = vpack.c.bf16 %v145_v23, %v145_v23  ;;  %v143_v26 = vmax.f32 %v139_v24, 0.0 }
  0xdf   :  { %166 = vst.msk [vmem:[%s278_s4 + $0xc] sm:$0xf] %vm162_vm1, %v188_v25  ;;  %v186_v27 = vpack.c.bf16 %v143_v26, %v143_v26 }
  0xe1   :  { %164 = vst.msk [vmem:[%s278_s4 + $0x4] sm:$0xf] %vm162_vm1, %v186_v27 }

// kernel: pointnet_features.18
= control target key start
LH: loop header
LB: loop body
LE: loop exit
PB: predicated region body
PF: predicated region fallthrough
CT: control target
= control target key end

     0   :  { %vm64_vm0 = vcmask 523264   ;;  %s278_s1 = inlined_call_operand.vmem [shape: bf16[64,128], index: 1, kind: input, shape index: {}]   ;;  %s279_s0 = inlined_call_operand.vmem [shape: bf16[32,64], index: 0, kind: input, shape index: {}]   ;;  %s280_s2 = inlined_call_operand.vmem [shape: f32[1,128], index: 2, kind: input, shape index: {}]   ;;  %s281_s3 = inlined_call_operand.vmem [shape: f32[1,128], index: 3, kind: input, shape index: {}]   ;;  %s282_s4 = inlined_call_operand.vmem [shape: bf16[32,128], index: 4, kind: output, shape index: {}]  }
   0x1   :  { %v217_v0 = vld [vmem:[%s278_s1 + $0x18] sm:$0xff]   ;;  %v218_v1 = vld [vmem:[%s278_s1 + $0x10] sm:$0xff]   ;;  %v219_v2 = vld [vmem:[%s278_s1 + $0x8] sm:$0xff]  }
   0x2   :  { %205 = vmatprep.subr.bf16.mxu0 %v217_v0  ;;  %v221_v3 = vld [vmem:[%s279_s0] sm:$0xff]   ;;  %v222_v5 = vld [vmem:[%s279_s0 + $0x8] sm:$0xff]  }
   0x3   :  { %206 = vmatpush3.bf16.msra.mxu0 %v217_v0  ;;  %213 = vmatprep.mubr.msk.bf16.mxu0 %vm64_vm0, %v221_v3  ;;  %v220_v4 = vld [vmem:[%s278_s1] sm:$0xff]  }
   0x4   :  { %207 = vmatprep.subr.bf16.mxu0 %v218_v1  ;;  %v178_v6 = vld [vmem:[%s280_s2] ss:$0 sm:$0xff] }
   0x5   :  { %v179_v9 = vld [vmem:[%s281_s3] ss:$0 sm:$0xff] }
   0x7   :  { %208 = vmatpush3.bf16.msra.mxu0 %v218_v1 }
   0x8   :  { %209 = vmatprep.subr.bf16.mxu0 %v219_v2 }
   0xb   :  { %210 = vmatpush3.bf16.msra.mxu0 %v219_v2 }
   0xc   :  { %211 = vmatprep.subr.bf16.mxu0 %v220_v4 }
   0xf   :  { %212 = vmatpush3.bf16.msra.mxu0 %v220_v4 }
  0x12   :  { %214 = vmatmul.mubr.msk.bf16.vlgmr.msra.gmra.mxu0 %vm64_vm0, %v222_v5 }
  0xd2   :  { %v215_v7 = vpop.f32.mrf.mxu0 }
  0xd3   :  { %v129_v8 = vmul.f32 %v215_v7, %v178_v6 }
  0xd4   :  { %v105_v10 = vpop.f32.mrf.mxu0 }
  0xd5   :  { %v127_v11 = vmul.f32 %v178_v6, %v105_v10  ;;  %v140_v13 = vadd.f32 %v179_v9, %v129_v8 }
  0xd6   :  { %v216_v12 = vpop.f32.mrf.mxu0 }
  0xd7   :  { %v130_v14 = vmul.f32 %v216_v12, %v178_v6  ;;  %v138_v16 = vadd.f32 %v179_v9, %v127_v11  ;;  %v144_v19 = vmax.f32 %v140_v13, 0.0 }
  0xd8   :  { %v108_v15 = vpop.f32.mrf.mxu0 }
  0xd9   :  { %v141_v17 = vadd.f32 %v179_v9, %v130_v14  ;;  %v128_v18 = vmul.f32 %v178_v6, %v108_v15  ;;  %v142_v22 = vmax.f32 %v138_v16, 0.0 }
  0xdb   :  { %v145_v20 = vmax.f32 %v141_v17, 0.0  ;;  %v139_v21 = vadd.f32 %v179_v9, %v128_v18 }
  0xdd   :  { %v196_v23 = vpack.c.bf16 %v145_v20, %v144_v19  ;;  %v143_v24 = vmax.f32 %v139_v21, 0.0 }
  0xdf   :  { %198 = vst [vmem:[%s282_s4 + $0x8] sm:$0xff] %v196_v23   ;;  %v191_v25 = vpack.c.bf16 %v143_v24, %v142_v22 }
  0xe1   :  { %192 = vst [vmem:[%s282_s4] sm:$0xff] %v191_v25  }

// kernel: pointnet_features.19
= control target key start
LH: loop header
LB: loop body
LE: loop exit
PB: predicated region body
PF: predicated region fallthrough
CT: control target
= control target key end

     0   :  { %v419_v2 = vmov 0.0   ;;  %vm99_vm0 = vcmask 261120   ;;  %s514_s0 = inlined_call_operand.vmem [shape: bf16[32,128], index: 0, kind: input, shape index: {}]   ;;  %s515_s1 = inlined_call_operand.vmem [shape: f32[1,128], index: 1, kind: output, shape index: {0}]   ;;  %s516_s2 = inlined_call_operand.vmem [shape: f32[128,128], index: 2, kind: output, shape index: {1}]  }
   0x1   :  { %v350_v0 = vld [vmem:[%s514_s0] sm:$0xff]   ;;  %v357_v1 = vld [vmem:[%s514_s0 + $0x8] sm:$0xff]   ;;  %14 = vst [vmem:[%s515_s1] sm:$0x1] %v419_v2 }
   0x2   :  { %v351_v3 = vunpack.c.l.bf16 %v350_v0  ;;  %v352_v4 = vunpack.c.h.bf16 %v350_v0  ;;  %v356_v5 = vunpack.c.h.bf16 %v357_v1  ;;  %v355_v7 = vunpack.c.l.bf16 %v357_v1 }
   0x4   :  { %67 = vxpose.xlu0.b32.start [1/4] (short) %v351_v3, 128  ;;  %v40_v6 = vadd.f32 %v352_v4, %v351_v3  ;;  %378 = vmatprep.subr.mxu0 %v356_v5 }
   0x5   :  { %379 = vmatpush3.msra.mxu0 %v356_v5  ;;  %410 = vmatprep.subr.mxu1 %v356_v5 }
   0x6   :  { %v41_v8 = vadd.f32 %v355_v7, %v40_v6  ;;  %380 = vmatprep.subr.mxu0 %v355_v7  ;;  %414 = vmatpush3.msra.mxu1 %v356_v5 }
   0x7   :  { %381 = vmatpush3.msra.mxu0 %v355_v7  ;;  %411 = vmatprep.subr.mxu1 %v355_v7 }
   0x8   :  { %68 = vxpose.xlu0.b32.cont [2/4] (short) %v352_v4, 128  ;;  %v42_v9 = vadd.f32 %v356_v5, %v41_v8  ;;  %382 = vmatprep.subr.mxu0 %v352_v4  ;;  %v39_v15 = vld [vmem:[%s515_s1] sm:$0x1] }
   0x9   :  { %383 = vmatpush3.msra.mxu0 %v352_v4  ;;  %415 = vmatpush3.msra.mxu1 %v355_v7 }
   0xa   :  { %v43_v10 = vrot.slane %v42_v9, 4  ;;  %384 = vmatprep.subr.mxu0 %v351_v3  ;;  %412 = vmatprep.subr.mxu1 %v352_v4 }
   0xb   :  { %385 = vmatpush3.msra.mxu0 %v351_v3  ;;  %416 = vmatpush3.msra.mxu1 %v352_v4 }
   0xc   :  { %69 = vxpose.xlu0.b32.cont [3/4] (short) %v355_v7, 128  ;;  %v44_v11 = vadd.f32 %v43_v10, %v42_v9  ;;  %413 = vmatprep.subr.mxu1 %v351_v3 }
   0xd   :  { %417 = vmatpush3.msra.mxu1 %v351_v3 }
   0xe   :  { %v45_v12 = vrot.slane %v44_v11, 2 }
  0x10   :  { %70 = vxpose.xlu0.b32.end [4/4] (short) %v356_v5, 128  ;;  %v46_v13 = vadd.f32 %v45_v12, %v44_v11 }
  0x12   :  { %v47_v14 = vrot.slane %v46_v13, 1 }
  0x14   :  { %v48_v16 = vadd.f32 %v47_v14, %v46_v13 }
  0x16   :  { %v49_v17 = vadd.f32 %v48_v16, %v39_v15 }
  0x18   :  { %50 = vst [vmem:[%s515_s1] sm:$0x1] %v49_v17 }
  0x80   :  { %v83_v18 = vpop.trf.xlu0 }
  0x81   :  { %386 = vmatprep.mubr.msk.f32.mxu0 %vm99_vm0, %v83_v18 }
  0x84   :  { %v84_v19 = vpop.trf.xlu0 }
  0x85   :  { %387 = vmatmul.mubr.msk.f32.vlgmr.msra.gmra.mxu0 %vm99_vm0, %v84_v19 }
  0x88   :  { %v85_v20 = vpop.trf.xlu0 }
  0x89   :  { %389 = vmatprep.mubr.msk.f32.mxu0 %vm99_vm0, %v85_v20 }
  0x8c   :  { %v86_v21 = vpop.trf.xlu0 }
  0x8d   :  { %390 = vmatmul.mubr.msk.f32.gmra.mxu0 %vm99_vm0, %v86_v21 }
  0x90   :  { %v87_v22 = vpop.trf.xlu0 }
  0x91   :  { %392 = vmatprep.mubr.msk.f32.mxu0 %vm99_vm0, %v87_v22 }
  0x94   :  { %v88_v23 = vpop.trf.xlu0 }
  0x95   :  { %393 = vmatmul.mubr.msk.f32.gmra.mxu0 %vm99_vm0, %v88_v23 }
  0x98   :  { %v89_v24 = vpop.trf.xlu0 }
  0x99   :  { %395 = vmatprep.mubr.msk.f32.mxu0 %vm99_vm0, %v89_v24 }
  0x9c   :  { %v90_v25 = vpop.trf.xlu0 }
  0x9d   :  { %396 = vmatmul.mubr.msk.f32.gmra.mxu0 %vm99_vm0, %v90_v25 }
  0xa0   :  { %v91_v26 = vpop.trf.xlu0 }
  0xa1   :  { %398 = vmatprep.mubr.msk.f32.mxu1 %vm99_vm0, %v91_v26 }
  0xa4   :  { %v92_v27 = vpop.trf.xlu0 }
  0xa5   :  { %399 = vmatmul.mubr.msk.f32.vlgmr.msra.gmra.mxu1 %vm99_vm0, %v92_v27 }
  0xa8   :  { %v93_v28 = vpop.trf.xlu0 }
  0xa9   :  { %401 = vmatprep.mubr.msk.f32.mxu1 %vm99_vm0, %v93_v28 }
  0xac   :  { %v94_v29 = vpop.trf.xlu0 }
  0xad   :  { %402 = vmatmul.mubr.msk.f32.gmra.mxu1 %vm99_vm0, %v94_v29 }
  0xb0   :  { %v95_v30 = vpop.trf.xlu0 }
  0xb1   :  { %404 = vmatprep.mubr.msk.f32.mxu1 %vm99_vm0, %v95_v30 }
  0xb4   :  { %v96_v31 = vpop.trf.xlu0 }
  0xb5   :  { %405 = vmatmul.mubr.msk.f32.gmra.mxu1 %vm99_vm0, %v96_v31 }
  0xb8   :  { %v97_v32 = vpop.trf.xlu0 }
  0xb9   :  { %407 = vmatprep.mubr.msk.f32.mxu1 %vm99_vm0, %v97_v32 }
  0xbc   :  { %v98_v33 = vpop.trf.xlu0 }
  0xbd   :  { %408 = vmatmul.mubr.msk.f32.gmra.mxu1 %vm99_vm0, %v98_v33 }
 0x145   :  { %v388_v34 = vpop.f32.mrf.mxu0 }
 0x146   :  { %310 = vst [vmem:[%s516_s2 + $0x8] sm:$0xff] %v388_v34 }
 0x147   :  { %v214_v35 = vpop.f32.mrf.mxu0 }
 0x148   :  { %309 = vst [vmem:[%s516_s2] sm:$0xff] %v214_v35 }
 0x14d   :  { %v391_v36 = vpop.f32.mrf.mxu0 }
 0x14e   :  { %312 = vst [vmem:[%s516_s2 + $0x18] sm:$0xff] %v391_v36 }
 0x14f   :  { %v224_v37 = vpop.f32.mrf.mxu0 }
 0x150   :  { %311 = vst [vmem:[%s516_s2 + $0x10] sm:$0xff] %v224_v37 }
 0x155   :  { %v394_v38 = vpop.f32.mrf.mxu0 }
 0x156   :  { %314 = vst [vmem:[%s516_s2 + $0x28] sm:$0xff] %v394_v38 }
 0x157   :  { %v234_v39 = vpop.f32.mrf.mxu0 }
 0x158   :  { %313 = vst [vmem:[%s516_s2 + $0x20] sm:$0xff] %v234_v39 }
 0x15d   :  { %v397_v40 = vpop.f32.mrf.mxu0 }
 0x15e   :  { %316 = vst [vmem:[%s516_s2 + $0x38] sm:$0xff] %v397_v40 }
 0x15f   :  { %v244_v41 = vpop.f32.mrf.mxu0 }
 0x160   :  { %315 = vst [vmem:[%s516_s2 + $0x30] sm:$0xff] %v244_v41 }
 0x165   :  { %v400_v42 = vpop.f32.mrf.mxu1 }
 0x166   :  { %318 = vst [vmem:[%s516_s2 + $0x48] sm:$0xff] %v400_v42 }
 0x167   :  { %v254_v43 = vpop.f32.mrf.mxu1 }
 0x168   :  { %317 = vst [vmem:[%s516_s2 + $0x40] sm:$0xff] %v254_v43 }
 0x16d   :  { %v403_v44 = vpop.f32.mrf.mxu1 }
 0x16e   :  { %320 = vst [vmem:[%s516_s2 + $0x58] sm:$0xff] %v403_v44 }
 0x16f   :  { %v264_v45 = vpop.f32.mrf.mxu1 }
 0x170   :  { %319 = vst [vmem:[%s516_s2 + $0x50] sm:$0xff] %v264_v45 }
 0x175   :  { %v406_v46 = vpop.f32.mrf.mxu1 }
 0x176   :  { %322 = vst [vmem:[%s516_s2 + $0x68] sm:$0xff] %v406_v46 }
 0x177   :  { %v274_v47 = vpop.f32.mrf.mxu1 }
 0x178   :  { %321 = vst [vmem:[%s516_s2 + $0x60] sm:$0xff] %v274_v47 }
 0x17d   :  { %v409_v48 = vpop.f32.mrf.mxu1 }
 0x17e   :  { %324 = vst [vmem:[%s516_s2 + $0x78] sm:$0xff] %v409_v48 }
 0x17f   :  { %v284_v49 = vpop.f32.mrf.mxu1 }
 0x180   :  { %323 = vst [vmem:[%s516_s2 + $0x70] sm:$0xff] %v284_v49 }

// kernel: pointnet_features.20
= control target key start
LH: loop header
LB: loop body
LE: loop exit
PB: predicated region body
PF: predicated region fallthrough
CT: control target
= control target key end

     0   :  { %s1186_s15 = smov 0   ;;  %s1188_s16 = smov 0   ;;  %s1447_s0 = inlined_call_operand.vmem [shape: bf16[32,128], index: 0, kind: input, shape index: {}]   ;;  %s1448_s1 = inlined_call_operand.vmem [shape: bf16[128,1024], index: 1, kind: input, shape index: {}]   ;;  %s1449_s2 = inlined_call_operand.vmem [shape: f32[1,1024], index: 2, kind: input, shape index: {}]   ;;  %s1450_s3 = inlined_call_operand.vmem [shape: f32[1,1024], index: 3, kind: input, shape index: {}]   ;;  %s1451_s4 = inlined_call_operand.vmem [shape: bf16[32,1024], index: 4, kind: output, shape index: {}]  }
   0x1   :  { %s1190_s17 = smov 0   ;;  %s1192_s18 = smov 0  }
   0x2   :  { %s1194_s19 = smov 0  }
   0x3 LB: > { %s23_s20 = sadd.s32 1, %s1154_s18  ;;  %s959_s21 = sadd.s32 4294967295, %s1158_s19   ;;  %s1158_s19 = sphi %s1194_s19, %s14_s19   ;;  %s1154_s18 = sphi %s1192_s18, %s1456_s18   ;;  %s1150_s17 = sphi %s1190_s17, %s1455_s17   ;;  %s1146_s16 = sphi %s1188_s16, %s1454_s16   ;;  %s1142_s15 = sphi %s1186_s15, %s1453_s15  }
   0x4   : > { %p24_p0 = scmp.ge.s32.totalorder %s23_s20, 2  ;;  %p66_p1 = scmp.ne.s32.totalorder %s1146_s16, %s1142_s15 }
   0x5   : > { %p67_p2 = scmp.eq.s32.totalorder %s1158_s19, 0  ;;  %p150_p4 = scmp.eq.s32.totalorder %s959_s21, 1 }
   0x6   : > { %s1458_s20 = smov (%p24_p0, %s23_s20), 0  ;;  %s59_s23 = sadd.s32 1, %s1146_s16 }
   0x7   : > { %p68_p3 = por %p67_p2, %p66_p1  ;;  %s56_s22 = ssub.s32 %s1154_s18, %s1458_s20 }
   0x8   : > { %p57_p5 = scmp.eq.s32.totalorder %s56_s22, 0  ;;  %p1221_p6 = por %p150_p4, %p66_p1 }
   0x9   : > { %p963_p7 = scmp.ge.s32.totalorder %s1158_s19, 2 }
   0xa   : > { %s1226_s25 = scalar_select %p57_p5, %s1146_s16, %s59_s23  }
   0xb   : > { %181 = sbr.rel (%p963_p7) target bundleno = 36 (0x24), region = 20 }
  0x10   : > { %184 = sbr.rel (!%p68_p3) target bundleno = 36 (0x24), region = 24  ;;  %s186_s26 = sand.u32 (%p68_p3), 1, %s1146_s16  }
  0x11   : > { %s1019_s27 = sshll.u32 (%p68_p3), %s1154_s18, 4  ;;  %s964_s28 = sshll.u32 (%p68_p3), %s186_s26, 8 }
  0x12   : > { %s1234_s5 = scalar_lea.vmem (%p68_p3), %s1448_s1, %s1019_s27  ;;  %s1239_s6 = scalar_lea.vmem (%p68_p3), [#allocation2], %s964_s28 }
  0x13   : > { %v204_v0 = vld [vmem:[%s1234_s5] sm:$0xff] (%p68_p3)  ;;  %v206_v1 = vld [vmem:[%s1234_s5 + $0x8] sm:$0xff] (%p68_p3) }
  0x14   : > { %v208_v2 = vld [vmem:[%s1234_s5 + $0x20] sm:$0xff] (%p68_p3)  ;;  %205 = vst [vmem:[%s1239_s6] sm:$0xff] (%p68_p3), %v204_v0  ;;  %207 = vst [vmem:[%s1239_s6 + $0x8] sm:$0xff] (%p68_p3), %v206_v1  ;;  %v210_v3 = vld [vmem:[%s1234_s5 + $0x28] sm:$0xff] (%p68_p3) }
  0x15   : > { %209 = vst [vmem:[%s1239_s6 + $0x10] sm:$0xff] %v208_v2  ;;  %v212_v4 = vld [vmem:[%s1234_s5 + $0x40] sm:$0xff]  ;;  %v214_v5 = vld [vmem:[%s1234_s5 + $0x48] sm:$0xff]  ;;  %211 = vst [vmem:[%s1239_s6 + $0x18] sm:$0xff] %v210_v3 }
  0x16   : > { %213 = vst [vmem:[%s1239_s6 + $0x20] sm:$0xff] %v212_v4  ;;  %215 = vst [vmem:[%s1239_s6 + $0x28] sm:$0xff] %v214_v5  ;;  %v216_v6 = vld [vmem:[%s1234_s5 + $0x60] sm:$0xff]  ;;  %v218_v7 = vld [vmem:[%s1234_s5 + $0x68] sm:$0xff] }
  0x17   : > { %v220_v8 = vld [vmem:[%s1234_s5 + $0x80] sm:$0xff]  ;;  %217 = vst [vmem:[%s1239_s6 + $0x30] sm:$0xff] %v216_v6  ;;  %219 = vst [vmem:[%s1239_s6 + $0x38] sm:$0xff] %v218_v7  ;;  %v222_v9 = vld [vmem:[%s1234_s5 + $0x88] sm:$0xff] }
  0x18   : > { %221 = vst [vmem:[%s1239_s6 + $0x40] sm:$0xff] %v220_v8  ;;  %v224_v10 = vld [vmem:[%s1234_s5 + $0xa0] sm:$0xff]  ;;  %v226_v11 = vld [vmem:[%s1234_s5 + $0xa8] sm:$0xff]  ;;  %223 = vst [vmem:[%s1239_s6 + $0x48] sm:$0xff] %v222_v9 }
  0x19   : > { %225 = vst [vmem:[%s1239_s6 + $0x50] sm:$0xff] %v224_v10  ;;  %227 = vst [vmem:[%s1239_s6 + $0x58] sm:$0xff] %v226_v11  ;;  %v228_v12 = vld [vmem:[%s1234_s5 + $0xc0] sm:$0xff]  ;;  %v230_v13 = vld [vmem:[%s1234_s5 + $0xc8] sm:$0xff] }
  0x1a   : > { %v232_v14 = vld [vmem:[%s1234_s5 + $0xe0] sm:$0xff]  ;;  %229 = vst [vmem:[%s1239_s6 + $0x60] sm:$0xff] %v228_v12  ;;  %231 = vst [vmem:[%s1239_s6 + $0x68] sm:$0xff] %v230_v13  ;;  %v234_v15 = vld [vmem:[%s1234_s5 + $0xe8] sm:$0xff] }
  0x1b   : > { %233 = vst [vmem:[%s1239_s6 + $0x70] sm:$0xff] %v232_v14  ;;  %v236_v16 = vld [vmem:[%s1234_s5 + $0x100] sm:$0xff]  ;;  %v238_v17 = vld [vmem:[%s1234_s5 + $0x108] sm:$0xff]  ;;  %235 = vst [vmem:[%s1239_s6 + $0x78] sm:$0xff] %v234_v15 }
  0x1c   : > { %237 = vst [vmem:[%s1239_s6 + $0x80] sm:$0xff] %v236_v16  ;;  %239 = vst [vmem:[%s1239_s6 + $0x88] sm:$0xff] %v238_v17  ;;  %v240_v18 = vld [vmem:[%s1234_s5 + $0x120] sm:$0xff]  ;;  %v242_v19 = vld [vmem:[%s1234_s5 + $0x128] sm:$0xff] }
  0x1d   : > { %v244_v20 = vld [vmem:[%s1234_s5 + $0x140] sm:$0xff]  ;;  %241 = vst [vmem:[%s1239_s6 + $0x90] sm:$0xff] %v240_v18  ;;  %243 = vst [vmem:[%s1239_s6 + $0x98] sm:$0xff] %v242_v19  ;;  %v246_v21 = vld [vmem:[%s1234_s5 + $0x148] sm:$0xff] }
  0x1e   : > { %245 = vst [vmem:[%s1239_s6 + $0xa0] sm:$0xff] %v244_v20  ;;  %v248_v22 = vld [vmem:[%s1234_s5 + $0x160] sm:$0xff]  ;;  %v250_v23 = vld [vmem:[%s1234_s5 + $0x168] sm:$0xff]  ;;  %247 = vst [vmem:[%s1239_s6 + $0xa8] sm:$0xff] %v246_v21 }
  0x1f   : > { %249 = vst [vmem:[%s1239_s6 + $0xb0] sm:$0xff] %v248_v22  ;;  %251 = vst [vmem:[%s1239_s6 + $0xb8] sm:$0xff] %v250_v23  ;;  %v252_v24 = vld [vmem:[%s1234_s5 + $0x180] sm:$0xff]  ;;  %v254_v25 = vld [vmem:[%s1234_s5 + $0x188] sm:$0xff] }
  0x20   : > { %v256_v26 = vld [vmem:[%s1234_s5 + $0x1a0] sm:$0xff]  ;;  %253 = vst [vmem:[%s1239_s6 + $0xc0] sm:$0xff] %v252_v24  ;;  %255 = vst [vmem:[%s1239_s6 + $0xc8] sm:$0xff] %v254_v25  ;;  %v258_v27 = vld [vmem:[%s1234_s5 + $0x1a8] sm:$0xff] }
  0x21   : > { %257 = vst [vmem:[%s1239_s6 + $0xd0] sm:$0xff] %v256_v26  ;;  %v260_v28 = vld [vmem:[%s1234_s5 + $0x1c0] sm:$0xff]  ;;  %v262_v29 = vld [vmem:[%s1234_s5 + $0x1c8] sm:$0xff]  ;;  %259 = vst [vmem:[%s1239_s6 + $0xd8] sm:$0xff] %v258_v27 }
  0x22   : > { %261 = vst [vmem:[%s1239_s6 + $0xe0] sm:$0xff] %v260_v28  ;;  %263 = vst [vmem:[%s1239_s6 + $0xe8] sm:$0xff] %v262_v29  ;;  %v264_v30 = vld [vmem:[%s1234_s5 + $0x1e0] sm:$0xff]  ;;  %v266_v31 = vld [vmem:[%s1234_s5 + $0x1e8] sm:$0xff] }
  0x23   : > { %265 = vst [vmem:[%s1239_s6 + $0xf0] sm:$0xff] %v264_v30  ;;  %267 = vst [vmem:[%s1239_s6 + $0xf8] sm:$0xff] %v266_v31 }
  0x24 PF: > { %p967_p8 = scmp.ge.s32.totalorder %s1158_s19, 1  ;;  %p288_p9 = scmp.lt.s32.totalorder %s1158_s19, 3 }
  0x26   : > { %p289_p10 = pnand %p967_p8, %p288_p9 }
  0x27   : > { %s295_s7 = sand.u32 (!%p289_p10), 1, %s1142_s15   ;;  %s970_s14 = sshll.u32 (!%p289_p10), %s1150_s17, 2 }
  0x28   : > { %292 = sbr.rel (%p289_p10) target bundleno = 303 (0x12f), region = 55  ;;  %s968_s8 = sshll.u32 (!%p289_p10), %s295_s7, 8 }
  0x29   : > { %s1309_s9 = scalar_lea.vmem (!%p289_p10), [#allocation2], %s968_s8  ;;  %p340_p11 = scmp.lt.s32.totalorder (!%p289_p10), %s970_s14, 7 }
  0x2a   : > { %s969_s29 = sshll.u32 (!%p289_p10), %s295_s7, 6 }
  0x2b   : > { %s1394_s15 = scalar_lea.vmem (!%p289_p10), [#allocation3], %s969_s29 }
  0x2d   : > { %v1160_v32 = vmov 0   ;;  %v1070_v33 = vld [vmem:[%s1309_s9 + $0xe4] ss:$16 sps:$4 sm:$0xff]   ;;  %v1072_v34 = vld [vmem:[%s1309_s9 + $0xec] ss:$16 sps:$4 sm:$0xff]   ;;  %v668_v3 = vlaneseq  ;;  %s1460_s14 = smov (!%p340_p11, %s970_s14), 7 }
  0x2e   : > { %592 = vmatprep.mubr.bf16.mxu0 %v1160_v32  ;;  %645 = vmatprep.mubr.bf16.mxu1 %v1160_v32  ;;  %v1074_v35 = vld [vmem:[%s1309_s9 + $0xe0] ss:$16 sps:$4 sm:$0xff]   ;;  %v1075_v36 = vld [vmem:[%s1309_s9 + $0xe8] ss:$16 sps:$4 sm:$0xff]   ;;  %v1076_v37 = vld [vmem:[%s1309_s9 + $0xc4] ss:$16 sps:$4 sm:$0xff]   ;;  %s342_s23 = scalar_lea.vmem %s1449_s2, %s1460_s14  ;;  %s347_s28 = scalar_lea.vmem %s1450_s3, %s1460_s14 }
  0x2f   : > { %560 = vmatprep.subr.bf16.mxu0 %v1070_v33  ;;  %613 = vmatprep.subr.bf16.mxu1 %v1072_v34  ;;  %v1078_v38 = vld [vmem:[%s1309_s9 + $0xcc] ss:$16 sps:$4 sm:$0xff]   ;;  %v1080_v39 = vld [vmem:[%s1309_s9 + $0xc0] ss:$16 sps:$4 sm:$0xff]   ;;  %v1081_v40 = vld [vmem:[%s1309_s9 + $0xc8] ss:$16 sps:$4 sm:$0xff]  }
  0x30   : > { %561 = vmatpush1.bf16.msra.mxu0 %v1074_v35  ;;  %614 = vmatpush1.bf16.msra.mxu1 %v1075_v36  ;;  %v1082_v41 = vld [vmem:[%s1309_s9 + $0xa4] ss:$16 sps:$4 sm:$0xff]   ;;  %v1084_v42 = vld [vmem:[%s1309_s9 + $0xac] ss:$16 sps:$4 sm:$0xff]   ;;  %v1086_v43 = vld [vmem:[%s1309_s9 + $0xa0] ss:$16 sps:$4 sm:$0xff]  }
  0x31   : > { %562 = vmatprep.subr.bf16.mxu0 %v1076_v37  ;;  %615 = vmatprep.subr.bf16.mxu1 %v1078_v38  ;;  %v1087_v44 = vld [vmem:[%s1309_s9 + $0xa8] ss:$16 sps:$4 sm:$0xff]   ;;  %v1088_v45 = vld [vmem:[%s1309_s9 + $0x84] ss:$16 sps:$4 sm:$0xff]   ;;  %v1090_v46 = vld [vmem:[%s1309_s9 + $0x8c] ss:$16 sps:$4 sm:$0xff]  }
  0x32   : > { %v1092_v47 = vld [vmem:[%s1309_s9 + $0x80] ss:$16 sps:$4 sm:$0xff]   ;;  %v1093_v48 = vld [vmem:[%s1309_s9 + $0x88] ss:$16 sps:$4 sm:$0xff]   ;;  %v1094_v49 = vld [vmem:[%s1309_s9 + $0x64] ss:$16 sps:$4 sm:$0xff]  }
  0x33   : > { %v1096_v50 = vld [vmem:[%s1309_s9 + $0x6c] ss:$16 sps:$4 sm:$0xff]   ;;  %v1098_v51 = vld [vmem:[%s1309_s9 + $0x60] ss:$16 sps:$4 sm:$0xff]   ;;  %v1099_v52 = vld [vmem:[%s1309_s9 + $0x68] ss:$16 sps:$4 sm:$0xff]  }
  0x34   : > { %563 = vmatpush1.bf16.msra.mxu0 %v1080_v39  ;;  %616 = vmatpush1.bf16.msra.mxu1 %v1081_v40  ;;  %v1100_v53 = vld [vmem:[%s1309_s9 + $0x44] ss:$16 sps:$4 sm:$0xff]   ;;  %v1102_v54 = vld [vmem:[%s1309_s9 + $0x4c] ss:$16 sps:$4 sm:$0xff]   ;;  %v1104_v55 = vld [vmem:[%s1309_s9 + $0x40] ss:$16 sps:$4 sm:$0xff]  }
  0x35   : > { %564 = vmatprep.subr.bf16.mxu0 %v1082_v41  ;;  %617 = vmatprep.subr.bf16.mxu1 %v1084_v42  ;;  %v1105_v56 = vld [vmem:[%s1309_s9 + $0x48] ss:$16 sps:$4 sm:$0xff]   ;;  %v1106_v57 = vld [vmem:[%s1309_s9 + $0x24] ss:$16 sps:$4 sm:$0xff]   ;;  %v1108_v58 = vld [vmem:[%s1309_s9 + $0x2c] ss:$16 sps:$4 sm:$0xff]  }
  0x36   : > { %v1110_v59 = vld [vmem:[%s1309_s9 + $0x20] ss:$16 sps:$4 sm:$0xff]   ;;  %v1111_v60 = vld [vmem:[%s1309_s9 + $0x28] ss:$16 sps:$4 sm:$0xff]   ;;  %v1112_v61 = vld [vmem:[%s1309_s9 + $0x4] ss:$16 sps:$4 sm:$0xff]  }
  0x37   : > { %v1114_v62 = vld [vmem:[%s1309_s9 + $0xc] ss:$16 sps:$4 sm:$0xff]   ;;  %v1116_v63 = vld [vmem:[%s1309_s9] ss:$16 sps:$4 sm:$0xff]   ;;  %v1117_v0 = vld [vmem:[%s1309_s9 + $0x8] ss:$16 sps:$4 sm:$0xff]  }
  0x38   : > { %565 = vmatpush1.bf16.msra.mxu0 %v1086_v43  ;;  %618 = vmatpush1.bf16.msra.mxu1 %v1087_v44  ;;  %v1118_v1 = vld [vmem:[%s1447_s0] sm:$0xff]   ;;  %v1119_v2 = vld [vmem:[%s1447_s0 + $0x8] sm:$0xff]   ;;  %v669_v4 = vshrl.u32 %v668_v3, 7  ;;  %s1028_s30 = sshll.u32 (%p1221_p6), %s1150_s17, 4 }
  0x39   : > { %566 = vmatprep.subr.bf16.mxu0 %v1088_v45  ;;  %619 = vmatprep.subr.bf16.mxu1 %v1090_v46  ;;  %v666_v7 = vld [vmem:[%s342_s23] sm:$0xf]  ;;  %s826_s7 = scalar_lea.vmem (%p1221_p6), %s1451_s4, %s1028_s30 }
  0x3a   : > { %v670_v5 = vsub.s32 0, %v669_v4  ;;  %v678_v6 = vsub.s32 2, %v669_v4  ;;  %v674_v8 = vsub.s32 1, %v669_v4  ;;  %v682_v9 = vsub.s32 3, %v669_v4  ;;  %v704_v10 = vld [vmem:[%s347_s28] sm:$0xf] }
  0x3c   : > { %567 = vmatpush1.bf16.msra.mxu0 %v1092_v47  ;;  %620 = vmatpush1.bf16.msra.mxu1 %v1093_v48  ;;  %v1358_v11 = vrot.slane %v666_v7, %v670_v5  ;;  %v1360_v12 = vrot.slane %v666_v7, %v678_v6  ;;  %v1362_v13 = vrot.slane %v704_v10, %v670_v5 }
  0x3d   : > { %568 = vmatprep.subr.bf16.mxu0 %v1094_v49  ;;  %621 = vmatprep.subr.bf16.mxu1 %v1096_v50  ;;  %v1364_v14 = vrot.slane %v704_v10, %v678_v6  ;;  %v1366_v15 = vrot.slane %v666_v7, %v674_v8  ;;  %v1368_v16 = vrot.slane %v666_v7, %v682_v9 }
  0x3e   : > { %v1372_v21 = vrot.slane %v704_v10, %v674_v8  ;;  %v1374_v22 = vrot.slane %v704_v10, %v682_v9 }
  0x40   : > { %569 = vmatpush1.bf16.msra.mxu0 %v1098_v51  ;;  %622 = vmatpush1.bf16.msra.mxu1 %v1099_v52 }
  0x41   : > { %570 = vmatprep.subr.bf16.mxu0 %v1100_v53  ;;  %623 = vmatprep.subr.bf16.mxu1 %v1102_v54 }
  0x44   : > { %571 = vmatpush1.bf16.msra.mxu0 %v1104_v55  ;;  %624 = vmatpush1.bf16.msra.mxu1 %v1105_v56 }
  0x45   : > { %572 = vmatprep.subr.bf16.mxu0 %v1106_v57  ;;  %625 = vmatprep.subr.bf16.mxu1 %v1108_v58 }
  0x48   : > { %573 = vmatpush1.bf16.msra.mxu0 %v1110_v59  ;;  %626 = vmatpush1.bf16.msra.mxu1 %v1111_v60 }
  0x49   : > { %574 = vmatprep.subr.bf16.mxu0 %v1112_v61  ;;  %627 = vmatprep.subr.bf16.mxu1 %v1114_v62 }
  0x4c   : > { %575 = vmatpush1.bf16.msra.mxu0 %v1116_v63  ;;  %628 = vmatpush1.bf16.msra.mxu1 %v1117_v0 }
  0x4f   : > { %593 = vmatmul.mubr.bf16.vlgmr.msra.gmra.mxu0 %v1118_v1  ;;  %646 = vmatmul.mubr.bf16.vlgmr.msra.gmra.mxu1 %v1118_v1 }
  0x50   : > { %602 = vmatprep.mubr.bf16.mxu0 %v1160_v32  ;;  %655 = vmatprep.mubr.bf16.mxu1 %v1160_v32 }
  0x57   : > { %603 = vmatmul.mubr.bf16.gmra.mxu0 %v1119_v2  ;;  %656 = vmatmul.mubr.bf16.gmra.mxu1 %v1119_v2 }
 0x10f   : > { %v594_v17 = vpop.f32.mrf.mxu0  ;;  %v647_v18 = vpop.f32.mrf.mxu1 }
 0x110   : > { %v688_v19 = vmul.f32 %v1358_v11, %v594_v17  ;;  %v690_v20 = vmul.f32 %v1360_v12, %v647_v18 }
 0x111   : > { %v596_v23 = vpop.f32.mrf.mxu0  ;;  %v649_v24 = vpop.f32.mrf.mxu1 }
 0x112   : > { %v726_v25 = vadd.f32 %v1362_v13, %v688_v19  ;;  %v728_v26 = vadd.f32 %v1364_v14, %v690_v20  ;;  %v689_v27 = vmul.f32 %v1366_v15, %v596_v23  ;;  %v691_v28 = vmul.f32 %v1368_v16, %v649_v24 }
 0x113   : > { %v598_v29 = vpop.f32.mrf.mxu0  ;;  %v651_v30 = vpop.f32.mrf.mxu1 }
 0x114   : > { %v727_v31 = vadd.f32 %v1372_v21, %v689_v27  ;;  %v729_v32 = vadd.f32 %v1374_v22, %v691_v28  ;;  %v742_v33 = vmax.f32 %v726_v25, 0.0  ;;  %v744_v34 = vmax.f32 %v728_v26, 0.0 }
 0x115   : > { %v692_v35 = vmul.f32 %v1358_v11, %v598_v29  ;;  %v694_v36 = vmul.f32 %v1360_v12, %v651_v30  ;;  %v600_v37 = vpop.f32.mrf.mxu0  ;;  %v653_v38 = vpop.f32.mrf.mxu1 }
 0x116   : > { %v743_v39 = vmax.f32 %v727_v31, 0.0  ;;  %v745_v40 = vmax.f32 %v729_v32, 0.0  ;;  %v693_v41 = vmul.f32 %v1366_v15, %v600_v37  ;;  %v695_v42 = vmul.f32 %v1368_v16, %v653_v38 }
 0x117   : > { %v730_v43 = vadd.f32 %v1362_v13, %v692_v35  ;;  %v732_v44 = vadd.f32 %v1364_v14, %v694_v36  ;;  %v604_v45 = vpop.f32.mrf.mxu0  ;;  %v657_v46 = vpop.f32.mrf.mxu1 }
 0x118   : > { %v1020_v47 = vpack.c.bf16 %v743_v39, %v742_v33  ;;  %v1021_v48 = vpack.c.bf16 %v745_v40, %v744_v34  ;;  %v731_v49 = vadd.f32 %v1372_v21, %v693_v41  ;;  %v733_v50 = vadd.f32 %v1374_v22, %v695_v42 }
 0x119   : > { %v746_v51 = vmax.f32 %v730_v43, 0.0  ;;  %v748_v52 = vmax.f32 %v732_v44, 0.0  ;;  %v696_v53 = vmul.f32 %v1358_v11, %v604_v45  ;;  %v698_v54 = vmul.f32 %v1360_v12, %v657_v46  ;;  %v606_v55 = vpop.f32.mrf.mxu0  ;;  %v659_v56 = vpop.f32.mrf.mxu1 }
 0x11a   : > { %806 = vst [vmem:[%s1394_s15] sm:$0xff] %v1020_v47  ;;  %807 = vst [vmem:[%s1394_s15 + $0x8] sm:$0xff] %v1021_v48  ;;  %v747_v57 = vmax.f32 %v731_v49, 0.0  ;;  %v749_v58 = vmax.f32 %v733_v50, 0.0  ;;  %v697_v59 = vmul.f32 %v1366_v15, %v606_v55  ;;  %v699_v60 = vmul.f32 %v1368_v16, %v659_v56 }
 0x11b   : > { %v734_v61 = vadd.f32 %v1362_v13, %v696_v53  ;;  %v736_v62 = vadd.f32 %v1364_v14, %v698_v54  ;;  %v608_v63 = vpop.f32.mrf.mxu0  ;;  %v661_v0 = vpop.f32.mrf.mxu1 }
 0x11c   : > { %v1022_v1 = vpack.c.bf16 %v747_v57, %v746_v51  ;;  %v1023_v2 = vpack.c.bf16 %v749_v58, %v748_v52  ;;  %v735_v3 = vadd.f32 %v1372_v21, %v697_v59  ;;  %v737_v4 = vadd.f32 %v1374_v22, %v699_v60 }
 0x11d   : > { %v750_v5 = vmax.f32 %v734_v61, 0.0  ;;  %v752_v6 = vmax.f32 %v736_v62, 0.0  ;;  %v700_v7 = vmul.f32 %v1358_v11, %v608_v63  ;;  %v702_v8 = vmul.f32 %v1360_v12, %v661_v0  ;;  %v610_v9 = vpop.f32.mrf.mxu0  ;;  %v663_v10 = vpop.f32.mrf.mxu1 }
 0x11e   : > { %808 = vst [vmem:[%s1394_s15 + $0x10] sm:$0xff] %v1022_v1  ;;  %809 = vst [vmem:[%s1394_s15 + $0x18] sm:$0xff] %v1023_v2  ;;  %v751_v17 = vmax.f32 %v735_v3, 0.0  ;;  %v753_v18 = vmax.f32 %v737_v4, 0.0  ;;  %v701_v19 = vmul.f32 %v1366_v15, %v610_v9  ;;  %v703_v20 = vmul.f32 %v1368_v16, %v663_v10 }
 0x11f   : > { %v738_v23 = vadd.f32 %v1362_v13, %v700_v7  ;;  %v740_v11 = vadd.f32 %v1364_v14, %v702_v8 }
 0x120   : > { %v1024_v24 = vpack.c.bf16 %v751_v17, %v750_v5  ;;  %v1025_v25 = vpack.c.bf16 %v753_v18, %v752_v6  ;;  %v739_v12 = vadd.f32 %v1372_v21, %v701_v19  ;;  %v741_v26 = vadd.f32 %v1374_v22, %v703_v20 }
 0x121   : > { %v754_v27 = vmax.f32 %v738_v23, 0.0  ;;  %v756_v28 = vmax.f32 %v740_v11, 0.0  ;;  %v839_v13 = vld [vmem:[%s1394_s15] sm:$0xff] (%p1221_p6)  ;;  %v841_v14 = vld [vmem:[%s1394_s15 + $0x8] sm:$0xff] (%p1221_p6) }
 0x122   : > { %810 = vst [vmem:[%s1394_s15 + $0x20] sm:$0xff] %v1024_v24  ;;  %811 = vst [vmem:[%s1394_s15 + $0x28] sm:$0xff] %v1025_v25  ;;  %v755_v29 = vmax.f32 %v739_v12, 0.0  ;;  %v757_v15 = vmax.f32 %v741_v26, 0.0  ;;  %820 = sbr.rel (!%p1221_p6) target bundleno = 303 (0x12f), region = 63 }
 0x123   : > { %840 = vst [vmem:[%s826_s7] sm:$0xff] (%p1221_p6), %v839_v13  ;;  %842 = vst [vmem:[%s826_s7 + $0x8] sm:$0xff] (%p1221_p6), %v841_v14 }
 0x124   : > { %v1026_v30 = vpack.c.bf16 %v755_v29, %v754_v27  ;;  %v1027_v31 = vpack.c.bf16 %v757_v15, %v756_v28 }
 0x125   : > { %v843_v16 = vld [vmem:[%s1394_s15 + $0x10] sm:$0xff] (%p1221_p6)  ;;  %v845_v21 = vld [vmem:[%s1394_s15 + $0x18] sm:$0xff] (%p1221_p6) }
 0x126   : > { %812 = vst [vmem:[%s1394_s15 + $0x30] sm:$0xff] %v1026_v30  ;;  %813 = vst [vmem:[%s1394_s15 + $0x38] sm:$0xff] %v1027_v31 }
 0x127   : > { %844 = vst [vmem:[%s826_s7 + $0x20] sm:$0xff] %v843_v16  ;;  %846 = vst [vmem:[%s826_s7 + $0x28] sm:$0xff] %v845_v21 }
 0x129   : > { %v847_v22 = vld [vmem:[%s1394_s15 + $0x20] sm:$0xff]  ;;  %v849_v32 = vld [vmem:[%s1394_s15 + $0x28] sm:$0xff] }
 0x12a   : > { %848 = vst [vmem:[%s826_s7 + $0x40] sm:$0xff] %v847_v22  ;;  %850 = vst [vmem:[%s826_s7 + $0x48] sm:$0xff] %v849_v32 }
 0x12d   : > { %v851_v33 = vld [vmem:[%s1394_s15 + $0x30] sm:$0xff]  ;;  %v853_v34 = vld [vmem:[%s1394_s15 + $0x38] sm:$0xff] }
 0x12e   : > { %852 = vst [vmem:[%s826_s7 + $0x60] sm:$0xff] %v851_v33  ;;  %854 = vst [vmem:[%s826_s7 + $0x68] sm:$0xff] %v853_v34 }
 0x12f PF: > { %s14_s19 = sadd.s32 1, %s1158_s19   ;;  %s1453_s15 = smov %s1146_s16 }
 0x130   : > { %p11_p12 = scmp.ge.s32.totalorder %s14_s19, 4   ;;  %s1454_s16 = smov %s1226_s25 }
 0x131   : > { %s1455_s17 = smov %s1154_s18  ;;  %s1456_s18 = smov %s1458_s20 }
 0x132   :  { %13 = sbr.rel (!%p11_p12) target bundleno = 3 (0x3), region = 126 }

// kernel: pointnet_features.21
= control target key start
LH: loop header
LB: loop body
LE: loop exit
PB: predicated region body
PF: predicated region fallthrough
CT: control target
= control target key end

     0   :  { %s959_s0 = inlined_call_operand.vmem [shape: bf16[2,16,1024], index: 0, kind: input, shape index: {}]   ;;  %s960_s1 = inlined_call_operand.vmem [shape: f32[2,1,1024], index: 1, kind: output, shape index: {}]  }
   0x1   :  { %v16_v0 = vld [vmem:[%s959_s0 + $0x40] sm:$0xff]  ;;  %v17_v1 = vld [vmem:[%s959_s0 + $0x48] sm:$0xff]  ;;  %v18_v2 = vld [vmem:[%s959_s0 + $0x50] sm:$0xff] }
   0x2   :  { %v19_v3 = vld [vmem:[%s959_s0 + $0x58] sm:$0xff]  ;;  %v20_v4 = vld [vmem:[%s959_s0 + $0x60] sm:$0xff]  ;;  %v21_v5 = vld [vmem:[%s959_s0 + $0x68] sm:$0xff]  ;;  %v662_v6 = vunpack.c.l.bf16 %v16_v0  ;;  %v664_v7 = vunpack.c.h.bf16 %v16_v0  ;;  %v666_v8 = vunpack.c.l.bf16 %v17_v1  ;;  %v668_v9 = vunpack.c.h.bf16 %v17_v1 }
   0x3   :  { %v22_v10 = vld [vmem:[%s959_s0 + $0x70] sm:$0xff]  ;;  %v23_v11 = vld [vmem:[%s959_s0 + $0x78] sm:$0xff]  ;;  %v676_v12 = vunpack.c.l.bf16 %v18_v2  ;;  %v678_v13 = vunpack.c.h.bf16 %v18_v2  ;;  %v680_v14 = vunpack.c.l.bf16 %v19_v3  ;;  %v682_v15 = vunpack.c.h.bf16 %v19_v3 }
   0x4   :  { %977 = vst [vmem:[#allocation2_spill] sm:$0xff] %v662_v6  ;;  %978 = vst [vmem:[#allocation3_spill] sm:$0xff] %v664_v7  ;;  %v684_v16 = vunpack.c.l.bf16 %v20_v4  ;;  %v686_v17 = vunpack.c.h.bf16 %v20_v4  ;;  %v688_v18 = vunpack.c.l.bf16 %v21_v5  ;;  %v690_v19 = vunpack.c.h.bf16 %v21_v5 }
   0x5   :  { %979 = vst [vmem:[#allocation4_spill] sm:$0xff] %v666_v8  ;;  %980 = vst [vmem:[#allocation5_spill] sm:$0xff] %v668_v9  ;;  %v692_v20 = vunpack.c.l.bf16 %v22_v10  ;;  %v694_v21 = vunpack.c.h.bf16 %v22_v10  ;;  %v696_v22 = vunpack.c.l.bf16 %v23_v11  ;;  %v698_v23 = vunpack.c.h.bf16 %v23_v11 }
   0x6   :  { %981 = vst [vmem:[#allocation6_spill] sm:$0xff] %v676_v12  ;;  %982 = vst [vmem:[#allocation7_spill] sm:$0xff] %v678_v13  ;;  %v112_v24 = vmax.f32 %v662_v6, %v684_v16  ;;  %v119_v25 = vmax.f32 %v664_v7, %v686_v17  ;;  %v126_v26 = vmax.f32 %v666_v8, %v688_v18 }
   0x7   :  { %983 = vst [vmem:[#allocation8_spill] sm:$0xff] %v680_v14  ;;  %984 = vst [vmem:[#allocation9_spill] sm:$0xff] %v682_v15  ;;  %v133_v27 = vmax.f32 %v668_v9, %v690_v19  ;;  %v140_v28 = vmax.f32 %v676_v12, %v692_v20  ;;  %v147_v29 = vmax.f32 %v678_v13, %v694_v21 }
   0x8   :  { %v154_v30 = vmax.f32 %v680_v14, %v696_v22  ;;  %v161_v31 = vmax.f32 %v682_v15, %v698_v23  ;;  %v113_v32 = vrot.slane %v112_v24, 4  ;;  %v120_v33 = vrot.slane %v119_v25, 4 }
   0x9   :  { %v127_v34 = vrot.slane %v126_v26, 4  ;;  %v134_v35 = vrot.slane %v133_v27, 4  ;;  %v141_v36 = vrot.slane %v140_v28, 4  ;;  %v148_v37 = vrot.slane %v147_v29, 4 }
   0xa   :  { %v155_v38 = vrot.slane %v154_v30, 4  ;;  %v162_v39 = vrot.slane %v161_v31, 4  ;;  %v114_v40 = vmax.f32 %v112_v24, %v113_v32  ;;  %v121_v41 = vmax.f32 %v119_v25, %v120_v33 }
   0xb   :  { %v128_v42 = vmax.f32 %v126_v26, %v127_v34  ;;  %v135_v43 = vmax.f32 %v133_v27, %v134_v35  ;;  %v142_v44 = vmax.f32 %v140_v28, %v141_v36  ;;  %v149_v45 = vmax.f32 %v147_v29, %v148_v37 }
   0xc   :  { %v156_v46 = vmax.f32 %v154_v30, %v155_v38  ;;  %v163_v47 = vmax.f32 %v161_v31, %v162_v39  ;;  %v115_v48 = vrot.slane %v114_v40, 2  ;;  %v122_v49 = vrot.slane %v121_v41, 2 }
   0xd   :  { %v129_v50 = vrot.slane %v128_v42, 2  ;;  %v136_v51 = vrot.slane %v135_v43, 2  ;;  %v143_v52 = vrot.slane %v142_v44, 2  ;;  %v150_v53 = vrot.slane %v149_v45, 2 }
   0xe   :  { %v157_v54 = vrot.slane %v156_v46, 2  ;;  %v164_v55 = vrot.slane %v163_v47, 2  ;;  %v116_v56 = vmax.f32 %v114_v40, %v115_v48  ;;  %v123_v57 = vmax.f32 %v121_v41, %v122_v49  ;;  %v8_v40 = vld [vmem:[%s959_s0] sm:$0xff]  ;;  %v9_v41 = vld [vmem:[%s959_s0 + $0x8] sm:$0xff] }
   0xf   :  { %v130_v58 = vmax.f32 %v128_v42, %v129_v50  ;;  %v137_v59 = vmax.f32 %v135_v43, %v136_v51  ;;  %v144_v60 = vmax.f32 %v142_v44, %v143_v52  ;;  %v151_v61 = vmax.f32 %v149_v45, %v150_v53  ;;  %v12_v52 = vld [vmem:[%s959_s0 + $0x20] sm:$0xff] }
  0x10   :  { %v158_v62 = vmax.f32 %v156_v46, %v157_v54  ;;  %v165_v63 = vmax.f32 %v163_v47, %v164_v55  ;;  %v117_v0 = vrot.slane %v116_v56, 1  ;;  %v124_v1 = vrot.slane %v123_v57, 1  ;;  %v10_v46 = vld [vmem:[%s959_s0 + $0x10] sm:$0xff]  ;;  %v11_v47 = vld [vmem:[%s959_s0 + $0x18] sm:$0xff]  ;;  %v13_v54 = vld [vmem:[%s959_s0 + $0x28] sm:$0xff] }
  0x11   :  { %v131_v2 = vrot.slane %v130_v58, 1  ;;  %v138_v3 = vrot.slane %v137_v59, 1  ;;  %v145_v4 = vrot.slane %v144_v60, 1  ;;  %v152_v5 = vrot.slane %v151_v61, 1  ;;  %v14_v55 = vld [vmem:[%s959_s0 + $0x30] sm:$0xff] }
  0x12   :  { %v159_v10 = vrot.slane %v158_v62, 1  ;;  %v166_v11 = vrot.slane %v165_v63, 1  ;;  %v716_v24 = vmax.f32 %v116_v56, %v117_v0  ;;  %v718_v25 = vmax.f32 %v123_v57, %v124_v1 }
  0x13   :  { %v720_v26 = vmax.f32 %v130_v58, %v131_v2  ;;  %v722_v27 = vmax.f32 %v137_v59, %v138_v3  ;;  %v724_v28 = vmax.f32 %v144_v60, %v145_v4  ;;  %v726_v29 = vmax.f32 %v151_v61, %v152_v5  ;;  %v15_v59 = vld [vmem:[%s959_s0 + $0x38] sm:$0xff] }
  0x14   :  { %v728_v30 = vmax.f32 %v158_v62, %v159_v10  ;;  %v730_v31 = vmax.f32 %v165_v63, %v166_v11  ;;  %v184_v32 = vsub.f32 %v662_v6, %v716_v24  ;;  %v185_v33 = vsub.f32 %v664_v7, %v718_v25 }
  0x15   :  { %v186_v34 = vsub.f32 %v666_v8, %v720_v26  ;;  %v187_v35 = vsub.f32 %v668_v9, %v722_v27  ;;  %v188_v36 = vsub.f32 %v676_v12, %v724_v28  ;;  %v189_v37 = vsub.f32 %v678_v13, %v726_v29 }
  0x16   :  { %v190_v38 = vsub.f32 %v680_v14, %v728_v30  ;;  %v191_v39 = vsub.f32 %v682_v15, %v730_v31  ;;  %v216_v42 = vmul.f32 %v184_v32, %v184_v32  ;;  %v217_v43 = vmul.f32 %v185_v33, %v185_v33 }
  0x17   :  { %v218_v44 = vmul.f32 %v186_v34, %v186_v34  ;;  %v219_v45 = vmul.f32 %v187_v35, %v187_v35  ;;  %v220_v48 = vmul.f32 %v188_v36, %v188_v36  ;;  %v221_v49 = vmul.f32 %v189_v37, %v189_v37 }
  0x18   :  { %v222_v50 = vmul.f32 %v190_v38, %v190_v38  ;;  %v223_v51 = vmul.f32 %v191_v39, %v191_v39  ;;  %v250_v53 = vadd.f32 %v217_v43, %v216_v42  ;;  %v769_v56 = vunpack.c.l.bf16 %v8_v40 }
  0x19   :  { %v771_v57 = vunpack.c.h.bf16 %v8_v40  ;;  %v773_v58 = vunpack.c.l.bf16 %v9_v41  ;;  %v778_v60 = vunpack.c.h.bf16 %v9_v41  ;;  %v780_v61 = vunpack.c.l.bf16 %v10_v46 }
  0x1a   :  { %v782_v62 = vunpack.c.h.bf16 %v10_v46  ;;  %v784_v63 = vunpack.c.l.bf16 %v11_v47  ;;  %v251_v0 = vadd.f32 %v250_v53, %v218_v44  ;;  %v786_v1 = vunpack.c.h.bf16 %v11_v47 }
  0x1b   :  { %v788_v2 = vunpack.c.l.bf16 %v12_v52  ;;  %v790_v3 = vunpack.c.h.bf16 %v12_v52  ;;  %v792_v4 = vunpack.c.l.bf16 %v13_v54  ;;  %v794_v5 = vunpack.c.h.bf16 %v13_v54 }
  0x1c   :  { %v796_v10 = vunpack.c.l.bf16 %v14_v55  ;;  %v798_v11 = vunpack.c.h.bf16 %v14_v55  ;;  %v252_v32 = vadd.f32 %v251_v0, %v219_v45  ;;  %v800_v33 = vunpack.c.l.bf16 %v15_v59 }
  0x1d   :  { %985 = vst [vmem:[#allocation10_spill] sm:$0xff] %v794_v5  ;;  %v802_v34 = vunpack.c.h.bf16 %v15_v59  ;;  %v56_v35 = vmax.f32 %v769_v56, %v788_v2  ;;  %v63_v36 = vmax.f32 %v771_v57, %v790_v3  ;;  %v70_v37 = vmax.f32 %v773_v58, %v792_v4 }
  0x1e   :  { %986 = vst [vmem:[#allocation11_spill] sm:$0xff] %v796_v10  ;;  %987 = vst [vmem:[#allocation12_spill] sm:$0xff] %v798_v11  ;;  %v77_v38 = vmax.f32 %v778_v60, %v794_v5  ;;  %v84_v39 = vmax.f32 %v780_v61, %v796_v10  ;;  %v253_v40 = vadd.f32 %v252_v32, %v220_v48 }
  0x1f   :  { %988 = vst [vmem:[#allocation13_spill] sm:$0xff] %v800_v33  ;;  %v57_v41 = vrot.slane %v56_v35, 4  ;;  %v91_v42 = vmax.f32 %v782_v62, %v798_v11  ;;  %v98_v43 = vmax.f32 %v784_v63, %v800_v33  ;;  %v64_v44 = vrot.slane %v63_v36, 4 }
  0x20   :  { %v71_v45 = vrot.slane %v70_v37, 4  ;;  %v78_v46 = vrot.slane %v77_v38, 4  ;;  %v85_v47 = vrot.slane %v84_v39, 4  ;;  %v254_v52 = vadd.f32 %v253_v40, %v221_v49 }
  0x21   :  { %v58_v53 = vmax.f32 %v56_v35, %v57_v41  ;;  %v92_v54 = vrot.slane %v91_v42, 4  ;;  %v99_v55 = vrot.slane %v98_v43, 4  ;;  %v65_v59 = vmax.f32 %v63_v36, %v64_v44 }
  0x22   :  { %v72_v0 = vmax.f32 %v70_v37, %v71_v45  ;;  %v79_v15 = vmax.f32 %v77_v38, %v78_v46  ;;  %v86_v14 = vmax.f32 %v84_v39, %v85_v47  ;;  %v255_v48 = vadd.f32 %v254_v52, %v222_v50 }
  0x23   :  { %v59_v32 = vrot.slane %v58_v53, 2  ;;  %v93_v13 = vmax.f32 %v91_v42, %v92_v54  ;;  %v100_v12 = vmax.f32 %v98_v43, %v99_v55  ;;  %v66_v9 = vrot.slane %v65_v59, 2 }
  0x24   :  { %v73_v8 = vrot.slane %v72_v0, 2  ;;  %v80_v7 = vrot.slane %v79_v15, 2  ;;  %v87_v6 = vrot.slane %v86_v14, 2  ;;  %v256_v33 = vadd.f32 %v255_v48, %v223_v51 }
  0x25   :  { %v60_v11 = vmax.f32 %v58_v53, %v59_v32  ;;  %v94_v10 = vrot.slane %v93_v13, 2  ;;  %v101_v5 = vrot.slane %v100_v12, 2  ;;  %v67_v49 = vmax.f32 %v65_v59, %v66_v9 }
  0x26   :  { %v74_v35 = vmax.f32 %v72_v0, %v73_v8  ;;  %v81_v40 = vmax.f32 %v79_v15, %v80_v7  ;;  %v88_v41 = vmax.f32 %v86_v14, %v87_v6  ;;  %257 = vadd.xlane.f32.xlu1 %v256_v33  ;;  %v105_v50 = vmax.f32 %v786_v1, %v802_v34 }
  0x27   :  { %v61_v36 = vrot.slane %v60_v11, 1  ;;  %v95_v37 = vmax.f32 %v93_v13, %v94_v10  ;;  %v102_v38 = vmax.f32 %v100_v12, %v101_v5  ;;  %v68_v39 = vrot.slane %v67_v49, 1 }
  0x28   :  { %v75_v42 = vrot.slane %v74_v35, 1  ;;  %v82_v43 = vrot.slane %v81_v40, 1  ;;  %v89_v44 = vrot.slane %v88_v41, 1  ;;  %v106_v47 = vrot.slane %v105_v50, 4 }
  0x29   :  { %v62_v45 = vmax.f32 %v60_v11, %v61_v36  ;;  %v96_v51 = vrot.slane %v95_v37, 1  ;;  %v103_v46 = vrot.slane %v102_v38, 1  ;;  %v69_v52 = vmax.f32 %v67_v49, %v68_v39 }
  0x2a   :  { %v76_v9 = vmax.f32 %v74_v35, %v75_v42  ;;  %v83_v8 = vmax.f32 %v81_v40, %v82_v43  ;;  %v90_v7 = vmax.f32 %v88_v41, %v89_v44  ;;  %v107_v14 = vmax.f32 %v105_v50, %v106_v47 }
  0x2b   :  { %v97_v6 = vmax.f32 %v95_v37, %v96_v51  ;;  %v168_v13 = vsub.f32 %v769_v56, %v62_v45  ;;  %v169_v12 = vsub.f32 %v771_v57, %v69_v52  ;;  %v104_v10 = vmax.f32 %v102_v38, %v103_v46 }
  0x2c   :  { %v170_v15 = vsub.f32 %v773_v58, %v76_v9  ;;  %v171_v5 = vsub.f32 %v778_v60, %v83_v8  ;;  %v108_v33 = vrot.slane %v107_v14, 2  ;;  %v172_v53 = vsub.f32 %v780_v61, %v90_v7 }
  0x2d   :  { %v200_v11 = vmul.f32 %v168_v13, %v168_v13  ;;  %v201_v54 = vmul.f32 %v169_v12, %v169_v12  ;;  %v173_v0 = vsub.f32 %v782_v62, %v97_v6  ;;  %v192_v32 = vsub.f32 %v684_v16, %v716_v24 }
  0x2e   :  { %v202_v55 = vmul.f32 %v170_v15, %v170_v15  ;;  %v109_v59 = vmax.f32 %v107_v14, %v108_v33  ;;  %v203_v48 = vmul.f32 %v171_v5, %v171_v5  ;;  %v193_v35 = vsub.f32 %v686_v17, %v718_v25 }
  0x2f   :  { %v232_v49 = vadd.f32 %v201_v54, %v200_v11  ;;  %v194_v40 = vsub.f32 %v688_v18, %v720_v26  ;;  %v195_v41 = vsub.f32 %v690_v19, %v722_v27  ;;  %v174_v37 = vsub.f32 %v784_v63, %v104_v10 }
  0x30   :  { %v110_v36 = vrot.slane %v109_v59, 1  ;;  %v204_v38 = vmul.f32 %v172_v53, %v172_v53  ;;  %v224_v39 = vmul.f32 %v192_v32, %v192_v32  ;;  %v225_v42 = vmul.f32 %v193_v35, %v193_v35  ;;  %v989_v53 = vld [vmem:[#allocation10_spill] sm:$0xff]  ;;  %v990_v32 = vld [vmem:[#allocation11_spill] sm:$0xff] }
  0x31   :  { %v233_v50 = vadd.f32 %v232_v49, %v202_v55  ;;  %v196_v24 = vsub.f32 %v692_v20, %v724_v28  ;;  %v226_v44 = vmul.f32 %v194_v40, %v194_v40  ;;  %v205_v51 = vmul.f32 %v173_v0, %v173_v0 }
  0x32   :  { %v111_v43 = vmax.f32 %v109_v59, %v110_v36  ;;  %v197_v26 = vsub.f32 %v694_v21, %v726_v29  ;;  %v227_v46 = vmul.f32 %v195_v41, %v195_v41  ;;  %v259_v47 = vadd.f32 %v225_v42, %v224_v39 }
  0x33   :  { %v234_v25 = vadd.f32 %v233_v50, %v203_v48  ;;  %v176_v14 = vsub.f32 %v788_v2, %v62_v45  ;;  %v177_v13 = vsub.f32 %v790_v3, %v69_v52  ;;  %v206_v12 = vmul.f32 %v174_v37, %v174_v37 }
  0x34   :  { %v175_v27 = vsub.f32 %v786_v1, %v111_v43  ;;  %v198_v5 = vsub.f32 %v696_v22, %v728_v30  ;;  %v178_v28 = vsub.f32 %v792_v4, %v76_v9  ;;  %v199_v33 = vsub.f32 %v698_v23, %v730_v31  ;;  %v991_v9 = vld [vmem:[#allocation12_spill] sm:$0xff] }
  0x35   :  { %v235_v15 = vadd.f32 %v234_v25, %v204_v38  ;;  %v228_v11 = vmul.f32 %v196_v24, %v196_v24  ;;  %v260_v29 = vadd.f32 %v259_v47, %v226_v44  ;;  %v179_v54 = vsub.f32 %v989_v53, %v83_v8  ;;  %v992_v8 = vld [vmem:[#allocation13_spill] sm:$0xff] }
  0x36   :  { %v207_v55 = vmul.f32 %v175_v27, %v175_v27  ;;  %v208_v0 = vmul.f32 %v176_v14, %v176_v14  ;;  %v209_v45 = vmul.f32 %v177_v13, %v177_v13  ;;  %v229_v48 = vmul.f32 %v197_v26, %v197_v26 }
  0x37   :  { %v236_v59 = vadd.f32 %v235_v15, %v205_v51  ;;  %v261_v52 = vadd.f32 %v260_v29, %v227_v46  ;;  %v180_v49 = vsub.f32 %v990_v32, %v90_v7  ;;  %v210_v35 = vmul.f32 %v178_v28, %v178_v28 }
  0x38   :  { %v230_v30 = vmul.f32 %v198_v5, %v198_v5  ;;  %v181_v36 = vsub.f32 %v991_v9, %v97_v6  ;;  %v211_v37 = vmul.f32 %v179_v54, %v179_v54  ;;  %v241_v31 = vadd.f32 %v209_v45, %v208_v0 }
  0x39   :  { %v237_v40 = vadd.f32 %v236_v59, %v206_v12  ;;  %v262_v41 = vadd.f32 %v261_v52, %v228_v11  ;;  %v231_v50 = vmul.f32 %v199_v33, %v199_v33  ;;  %v182_v42 = vsub.f32 %v992_v8, %v104_v10 }
  0x3a   :  { %v212_v24 = vmul.f32 %v180_v49, %v180_v49  ;;  %v242_v44 = vadd.f32 %v241_v31, %v210_v35  ;;  %v183_v25 = vsub.f32 %v802_v34, %v111_v43  ;;  %v213_v7 = vmul.f32 %v181_v36, %v181_v36 }
  0x3b   :  { %v238_v38 = vadd.f32 %v237_v40, %v207_v55  ;;  %v263_v39 = vadd.f32 %v262_v41, %v229_v48  ;;  %v214_v27 = vmul.f32 %v182_v42, %v182_v42 }
  0x3c   :  { %v243_v26 = vadd.f32 %v242_v44, %v211_v37  ;;  %v215_v6 = vmul.f32 %v183_v25, %v183_v25 }
  0x3d   :  { %239 = vadd.xlane.f32.xlu0 %v238_v38  ;;  %v264_v51 = vadd.f32 %v263_v39, %v230_v30 }
  0x3e   :  { %v244_v47 = vadd.f32 %v243_v26, %v212_v24 }
  0x3f   :  { %v265_v46 = vadd.f32 %v264_v51, %v231_v50 }
  0x40   :  { %v245_v14 = vadd.f32 %v244_v47, %v213_v7 }
  0x41   :  { %266 = vadd.xlane.f32.xlu1 %v265_v46 }
  0x42   :  { %v246_v13 = vadd.f32 %v245_v14, %v214_v27 }
  0x44   :  { %v247_v12 = vadd.f32 %v246_v13, %v215_v6 }
  0x46   :  { %248 = vadd.xlane.f32.xlu0 %v247_v12 }
  0xaf   :  { %v258_v15 = vpop.xlane.xlu1 %257 }
  0xb0   :  { %613 = vrsqrt.f32 %v258_v15  ;;  %vm284_vm0 = vcmp.eq.f32.partialorder %v258_v15, inf  ;;  %v287_v59 = vand.u32 2147483648, %v258_v15  ;;  %vm286_vm2 = vcmp.eq.f32.partialorder %v258_v15, 0.0 }
  0xbd   :  { %v614_v43 = vpop.eup %613 }
  0xbe   :  { %v283_v33 = vmul.f32 %v614_v43, %v258_v15 }
  0xc0   :  { %v285_v54 = vsel %vm284_vm0, %v258_v15, %v283_v33 }
  0xc1   :  { %v288_v52 = vsel %vm286_vm2, %v287_v59, %v285_v54 }
  0xc6   :  { %v240_v10 = vpop.xlane.xlu0 %239 }
  0xc7   :  { %615 = vrsqrt.f32 %v240_v10  ;;  %vm270_vm4 = vcmp.eq.f32.partialorder %v240_v10, inf  ;;  %v273_v37 = vand.u32 2147483648, %v240_v10  ;;  %vm272_vm6 = vcmp.eq.f32.partialorder %v240_v10, 0.0 }
  0xca   :  { %v267_v5 = vpop.xlane.xlu1 %266 }
  0xcb   :  { %617 = vrsqrt.f32 %v267_v5  ;;  %vm291_vm1 = vcmp.eq.f32.partialorder %v267_v5, inf  ;;  %v294_v0 = vand.u32 2147483648, %v267_v5  ;;  %vm293_vm3 = vcmp.eq.f32.partialorder %v267_v5, 0.0 }
  0xcf   :  { %v249_v28 = vpop.xlane.xlu0 %248 }
  0xd0   :  { %619 = vrsqrt.f32 %v249_v28  ;;  %vm277_vm5 = vcmp.eq.f32.partialorder %v249_v28, inf  ;;  %v280_v31 = vand.u32 2147483648, %v249_v28  ;;  %vm279_vm7 = vcmp.eq.f32.partialorder %v249_v28, 0.0 }
  0xd4   :  { %v616_v11 = vpop.eup %615 }
  0xd5   :  { %v269_v45 = vmul.f32 %v616_v11, %v240_v10 }
  0xd7   :  { %v271_v30 = vsel %vm270_vm4, %v240_v10, %v269_v45 }
  0xd8   :  { %v618_v29 = vpop.eup %617  ;;  %v274_v39 = vsel %vm272_vm6, %v273_v37, %v271_v30 }
  0xd9   :  { %v290_v55 = vmul.f32 %v618_v29, %v267_v5 }
  0xdb   :  { %v292_v48 = vsel %vm291_vm1, %v267_v5, %v290_v55 }
  0xdc   :  { %v295_v49 = vsel %vm293_vm3, %v294_v0, %v292_v48 }
  0xdd   :  { %v303_v35 = vmax.f32 %v288_v52, %v295_v49  ;;  %v620_v40 = vpop.eup %619 }
  0xde   :  { %v276_v41 = vmul.f32 %v620_v40, %v249_v28 }
  0xdf   :  { %v304_v36 = vrot.slane %v303_v35, 4 }
  0xe0   :  { %v278_v38 = vsel %vm277_vm5, %v249_v28, %v276_v41 }
  0xe1   :  { %v305_v50 = vmax.f32 %v303_v35, %v304_v36  ;;  %v281_v42 = vsel %vm279_vm7, %v280_v31, %v278_v38 }
  0xe2   :  { %v296_v24 = vmax.f32 %v274_v39, %v281_v42 }
  0xe3   :  { %v306_v44 = vrot.slane %v305_v50, 2 }
  0xe4   :  { %v297_v51 = vrot.slane %v296_v24, 4 }
  0xe5   :  { %v307_v25 = vmax.f32 %v305_v50, %v306_v44  ;;  %v633_v50 = vmov 1966171168  }
  0xe6   :  { %v298_v7 = vmax.f32 %v296_v24, %v297_v51 }
  0xe7   :  { %v308_v26 = vrot.slane %v307_v25, 1 }
  0xe8   :  { %v299_v46 = vrot.slane %v298_v7, 2 }
  0xe9   :  { %v309_v27 = vmax.f32 %v307_v25, %v308_v26 }
  0xea   :  { %v300_v47 = vmax.f32 %v298_v7, %v299_v46 }
  0xeb   :  { %v312_v6 = vsub.f32 %v288_v52, %v309_v27  ;;  %v313_v14 = vsub.f32 %v295_v49, %v309_v27 }
  0xec   :  { %v301_v13 = vrot.slane %v300_v47, 1 }
  0xed   :  { %v318_v12 = vmul.f32 1.442695, %v312_v6  ;;  %v320_v15 = vmul.f32 1.442695, %v313_v14  ;;  %v994_v14 = vld [vmem:[#allocation3_spill] sm:$0xff] }
  0xee   :  { %v302_v10 = vmax.f32 %v300_v47, %v301_v13  ;;  %v993_v47 = vld [vmem:[#allocation2_spill] sm:$0xff] }
  0xef   :  { %621 = vpow2.f32 %v318_v12  ;;  %v995_v12 = vld [vmem:[#allocation4_spill] sm:$0xff] }
  0xf0   :  { %623 = vpow2.f32 %v320_v15  ;;  %v310_v5 = vsub.f32 %v274_v39, %v302_v10  ;;  %v311_v28 = vsub.f32 %v281_v42, %v302_v10  ;;  %v511_v39 = vunpack.c.l.s4 %v633_v50  ;;  %v996_v10 = vld [vmem:[#allocation5_spill] sm:$0xff] }
  0xf1   :  { %v513_v42 = vlaneseq }
  0xf2   :  { %v314_v43 = vmul.f32 1.442695, %v310_v5  ;;  %v316_v33 = vmul.f32 1.442695, %v311_v28  ;;  %v512_v44 = vunpack.c.0.s8 %v511_v39 }
  0xf3   :  { %v514_v51 = vshrl.u32 %v513_v42, 7 }
  0xf4   :  { %625 = vpow2.f32 %v314_v43  ;;  %v997_v43 = vld [vmem:[#allocation6_spill] sm:$0xff] }
  0xf5   :  { %627 = vpow2.f32 %v316_v33  ;;  %v852_v27 = vsub.s32 %v512_v44, %v514_v51 }
  0xfc   :  { %v622_v11 = vpop.eup %621 }
  0xfd   :  { %v624_v29 = vpop.eup %623 }
  0xfe   :  { %v329_v54 = vadd.f32 %v624_v29, %v622_v11 }
 0x100   :  { %v330_v55 = vrot.slane %v329_v54, 4 }
 0x101   :  { %v626_v59 = vpop.eup %625 }
 0x102   :  { %v331_v0 = vadd.f32 %v330_v55, %v329_v54  ;;  %v628_v45 = vpop.eup %627  ;;  %v998_v54 = vld [vmem:[#allocation7_spill] sm:$0xff] }
 0x103   :  { %v322_v48 = vadd.f32 %v628_v45, %v626_v59 }
 0x104   :  { %v332_v52 = vrot.slane %v331_v0, 2 }
 0x105   :  { %v323_v49 = vrot.slane %v322_v48, 4 }
 0x106   :  { %v333_v35 = vadd.f32 %v332_v52, %v331_v0  ;;  %v1000_v0 = vld [vmem:[#allocation9_spill] sm:$0xff] }
 0x107   :  { %v324_v40 = vadd.f32 %v323_v49, %v322_v48 }
 0x108   :  { %v334_v30 = vrot.slane %v333_v35, 1 }
 0x109   :  { %v325_v41 = vrot.slane %v324_v40, 2 }
 0x10a   :  { %v335_v36 = vadd.f32 %v334_v30, %v333_v35 }
 0x10b   :  { %v326_v37 = vadd.f32 %v325_v41, %v324_v40 }
 0x10c   :  { %629 = vrcp.f32 %v335_v36 }
 0x10d   :  { %v327_v31 = vrot.slane %v326_v37, 1 }
 0x10f   :  { %v328_v38 = vadd.f32 %v327_v31, %v326_v37 }
 0x111   :  { %631 = vrcp.f32 %v328_v38 }
 0x119   :  { %v630_v24 = vpop.eup %629 }
 0x11a   :  { %v340_v25 = vmul.f32 %v630_v24, %v622_v11  ;;  %v341_v7 = vmul.f32 %v630_v24, %v624_v29  ;;  %v999_v11 = vld [vmem:[#allocation8_spill] sm:$0xff] }
 0x11c   :  { %v344_v26 = vsub.f32 1.0, %v340_v25  ;;  %v345_v46 = vsub.f32 1.0, %v341_v7 }
 0x11e   :  { %v362_v6 = vmul.f32 %v344_v26, %v993_v47  ;;  %v363_v13 = vmul.f32 %v344_v26, %v994_v14  ;;  %v364_v15 = vmul.f32 %v344_v26, %v995_v12  ;;  %v365_v5 = vmul.f32 %v344_v26, %v996_v10  ;;  %v632_v28 = vpop.eup %631 }
 0x11f   :  { %v859_v33 = vmul.f32 %v344_v26, %v997_v43  ;;  %v862_v55 = vmul.f32 %v344_v26, %v998_v54  ;;  %v865_v29 = vmul.f32 %v344_v26, %v999_v11  ;;  %v868_v48 = vmul.f32 %v344_v26, %v1000_v0 }
 0x120   :  { %v338_v52 = vmul.f32 %v632_v28, %v626_v59  ;;  %v339_v49 = vmul.f32 %v632_v28, %v628_v45  ;;  %v370_v35 = vmul.f32 %v345_v46, %v684_v16  ;;  %v371_v40 = vmul.f32 %v345_v46, %v686_v17 }
 0x121   :  { %v372_v30 = vmul.f32 %v345_v46, %v688_v18  ;;  %v373_v41 = vmul.f32 %v345_v46, %v690_v19  ;;  %v875_v36 = vmul.f32 %v345_v46, %v692_v20  ;;  %v878_v37 = vmul.f32 %v345_v46, %v694_v21 }
 0x122   :  { %v342_v31 = vsub.f32 1.0, %v338_v52  ;;  %v343_v38 = vsub.f32 1.0, %v339_v49  ;;  %v881_v50 = vmul.f32 %v345_v46, %v696_v22  ;;  %v884_v59 = vmul.f32 %v345_v46, %v698_v23 }
 0x123   :  { %v886_v16 = vmax.f32 %v362_v6, %v370_v35  ;;  %v888_v17 = vmax.f32 %v363_v13, %v371_v40  ;;  %v890_v18 = vmax.f32 %v364_v15, %v372_v30  ;;  %v892_v19 = vmax.f32 %v365_v5, %v373_v41 }
 0x124   :  { %v346_v20 = vmul.f32 %v342_v31, %v769_v56  ;;  %v347_v21 = vmul.f32 %v342_v31, %v771_v57  ;;  %v348_v45 = vmul.f32 %v342_v31, %v773_v58  ;;  %v349_v22 = vmul.f32 %v342_v31, %v778_v60 }
 0x125   :  { %v350_v39 = vmul.f32 %v342_v31, %v780_v61  ;;  %v351_v23 = vmul.f32 %v342_v31, %v782_v62  ;;  %v352_v42 = vmul.f32 %v342_v31, %v784_v63  ;;  %v353_v24 = vmul.f32 %v342_v31, %v786_v1 }
 0x126   :  { %v354_v44 = vmul.f32 %v343_v38, %v788_v2  ;;  %v355_v51 = vmul.f32 %v343_v38, %v790_v3  ;;  %v356_v56 = vmul.f32 %v343_v38, %v792_v4  ;;  %v357_v57 = vmul.f32 %v343_v38, %v989_v53 }
 0x127   :  { %v358_v58 = vmul.f32 %v343_v38, %v990_v32  ;;  %v359_v60 = vmul.f32 %v343_v38, %v991_v9  ;;  %v360_v61 = vmul.f32 %v343_v38, %v992_v8  ;;  %v361_v62 = vmul.f32 %v343_v38, %v802_v34 }
 0x128   :  { %v378_v25 = vmax.f32 %v346_v20, %v354_v44  ;;  %v385_v63 = vmax.f32 %v347_v21, %v355_v51  ;;  %v392_v7 = vmax.f32 %v348_v45, %v356_v56  ;;  %v399_v1 = vmax.f32 %v349_v22, %v357_v57 }
 0x129   :  { %v406_v26 = vmax.f32 %v350_v39, %v358_v58  ;;  %v413_v2 = vmax.f32 %v351_v23, %v359_v60  ;;  %v420_v46 = vmax.f32 %v352_v42, %v360_v61  ;;  %v427_v3 = vmax.f32 %v353_v24, %v361_v62 }
 0x12a   :  { %v379_v47 = vrot.slane %v378_v25, 4  ;;  %v386_v4 = vrot.slane %v385_v63, 4  ;;  %v393_v6 = vrot.slane %v392_v7, 4  ;;  %v400_v53 = vrot.slane %v399_v1, 4 }
 0x12b   :  { %v407_v14 = vrot.slane %v406_v26, 4  ;;  %v414_v32 = vrot.slane %v413_v2, 4  ;;  %v421_v13 = vrot.slane %v420_v46, 4  ;;  %v428_v9 = vrot.slane %v427_v3, 4 }
 0x12c   :  { %v380_v12 = vmax.f32 %v378_v25, %v379_v47  ;;  %v387_v8 = vmax.f32 %v385_v63, %v386_v4  ;;  %v394_v15 = vmax.f32 %v392_v7, %v393_v6  ;;  %v401_v34 = vmax.f32 %v399_v1, %v400_v53 }
 0x12d   :  { %v408_v10 = vmax.f32 %v406_v26, %v407_v14  ;;  %v415_v5 = vmax.f32 %v413_v2, %v414_v32  ;;  %v422_v28 = vmax.f32 %v420_v46, %v421_v13  ;;  %v429_v43 = vmax.f32 %v427_v3, %v428_v9 }
 0x12e   :  { %v381_v54 = vrot.slane %v380_v12, 2  ;;  %v388_v11 = vrot.slane %v387_v8, 2  ;;  %v395_v0 = vrot.slane %v394_v15, 2  ;;  %v402_v52 = vrot.slane %v401_v34, 2 }
 0x12f   :  { %v409_v49 = vrot.slane %v408_v10, 2  ;;  %v416_v35 = vrot.slane %v415_v5, 2  ;;  %v423_v40 = vrot.slane %v422_v28, 2  ;;  %v430_v30 = vrot.slane %v429_v43, 2 }
 0x130   :  { %v382_v41 = vmax.f32 %v380_v12, %v381_v54  ;;  %v389_v31 = vmax.f32 %v387_v8, %v388_v11  ;;  %v396_v38 = vmax.f32 %v394_v15, %v395_v0  ;;  %v403_v20 = vmax.f32 %v401_v34, %v402_v52 }
 0x131   :  { %v410_v21 = vmax.f32 %v408_v10, %v409_v49  ;;  %v417_v45 = vmax.f32 %v415_v5, %v416_v35  ;;  %v424_v22 = vmax.f32 %v422_v28, %v423_v40  ;;  %v431_v39 = vmax.f32 %v429_v43, %v430_v30 }
 0x132   :  { %v383_v23 = vrot.slane %v382_v41, 1  ;;  %v390_v42 = vrot.slane %v389_v31, 1  ;;  %v397_v24 = vrot.slane %v396_v38, 1  ;;  %v404_v44 = vrot.slane %v403_v20, 1 }
 0x133   :  { %v411_v51 = vrot.slane %v410_v21, 1  ;;  %v418_v56 = vrot.slane %v417_v45, 1  ;;  %v425_v57 = vrot.slane %v424_v22, 1  ;;  %v432_v58 = vrot.slane %v431_v39, 1 }
 0x134   :  { %v910_v60 = vmax.f32 %v382_v41, %v383_v23  ;;  %v912_v61 = vmax.f32 %v389_v31, %v390_v42  ;;  %v914_v62 = vmax.f32 %v396_v38, %v397_v24  ;;  %v916_v25 = vmax.f32 %v403_v20, %v404_v44 }
 0x135   :  { %v918_v63 = vmax.f32 %v410_v21, %v411_v51  ;;  %v419_v7 = vmax.f32 %v417_v45, %v418_v56  ;;  %v426_v1 = vmax.f32 %v424_v22, %v425_v57  ;;  %v433_v26 = vmax.f32 %v431_v39, %v432_v58 }
 0x136   :  { %v435_v2 = vrot.slane %v886_v16, 4  ;;  %v442_v46 = vrot.slane %v888_v17, 4  ;;  %v449_v3 = vrot.slane %v890_v18, 4  ;;  %v456_v47 = vrot.slane %v892_v19, 4 }
 0x137   :  { %v462_v4 = vmax.f32 %v859_v33, %v875_v36  ;;  %v469_v6 = vmax.f32 %v862_v55, %v878_v37  ;;  %v476_v53 = vmax.f32 %v865_v29, %v881_v50  ;;  %v483_v14 = vmax.f32 %v868_v48, %v884_v59 }
 0x138   :  { %v436_v32 = vmax.f32 %v886_v16, %v435_v2  ;;  %v443_v13 = vmax.f32 %v888_v17, %v442_v46  ;;  %v450_v9 = vmax.f32 %v890_v18, %v449_v3  ;;  %v457_v12 = vmax.f32 %v892_v19, %v456_v47 }
 0x139   :  { %v463_v8 = vrot.slane %v462_v4, 4  ;;  %v470_v15 = vrot.slane %v469_v6, 4  ;;  %v477_v33 = vrot.slane %v476_v53, 4  ;;  %v484_v36 = vrot.slane %v483_v14, 4 }
 0x13a   :  { %v437_v34 = vrot.slane %v436_v32, 2  ;;  %v444_v55 = vrot.slane %v443_v13, 2  ;;  %v451_v37 = vrot.slane %v450_v9, 2  ;;  %v458_v10 = vrot.slane %v457_v12, 2 }
 0x13b   :  { %v464_v29 = vmax.f32 %v462_v4, %v463_v8  ;;  %v471_v50 = vmax.f32 %v469_v6, %v470_v15  ;;  %v478_v5 = vmax.f32 %v476_v53, %v477_v33  ;;  %v485_v48 = vmax.f32 %v483_v14, %v484_v36 }
 0x13c   :  { %v438_v59 = vmax.f32 %v436_v32, %v437_v34  ;;  %v445_v16 = vmax.f32 %v443_v13, %v444_v55  ;;  %v452_v28 = vmax.f32 %v450_v9, %v451_v37  ;;  %v459_v17 = vmax.f32 %v457_v12, %v458_v10 }
 0x13d   :  { %v465_v43 = vrot.slane %v464_v29, 2  ;;  %v472_v18 = vrot.slane %v471_v50, 2  ;;  %v479_v54 = vrot.slane %v478_v5, 2  ;;  %v486_v19 = vrot.slane %v485_v48, 2 }
 0x13e   :  { %v439_v11 = vrot.slane %v438_v59, 1  ;;  %v446_v0 = vrot.slane %v445_v16, 1  ;;  %v453_v52 = vrot.slane %v452_v28, 1  ;;  %v460_v49 = vrot.slane %v459_v17, 1 }
 0x13f   :  { %v466_v35 = vmax.f32 %v464_v29, %v465_v43  ;;  %v473_v40 = vmax.f32 %v471_v50, %v472_v18  ;;  %v480_v30 = vmax.f32 %v478_v5, %v479_v54  ;;  %v487_v41 = vmax.f32 %v485_v48, %v486_v19 }
 0x140   :  { %v440_v31 = vmax.f32 %v438_v59, %v439_v11  ;;  %v447_v38 = vmax.f32 %v445_v16, %v446_v0  ;;  %v454_v20 = vmax.f32 %v452_v28, %v453_v52  ;;  %v461_v21 = vmax.f32 %v459_v17, %v460_v49 }
 0x141   :  { %v467_v45 = vrot.slane %v466_v35, 1  ;;  %v474_v22 = vrot.slane %v473_v40, 1  ;;  %v481_v39 = vrot.slane %v480_v30, 1  ;;  %v488_v23 = vrot.slane %v487_v41, 1 }
 0x142   :  { %v506_v42 = vcombine.low %v910_v60, %v912_v61  ;;  %v507_v24 = vcombine.low %v914_v62, %v916_v25  ;;  %v508_v44 = vcombine.low %v918_v63, %v419_v7  ;;  %v509_v51 = vcombine.low %v426_v1, %v433_v26 }
 0x143   :  { %v468_v56 = vmax.f32 %v466_v35, %v467_v45  ;;  %v475_v57 = vmax.f32 %v473_v40, %v474_v22  ;;  %v482_v58 = vmax.f32 %v480_v30, %v481_v39  ;;  %v489_v2 = vmax.f32 %v487_v41, %v488_v23 }
 0x144   :  { %v516_v46 = vrot.slane %v506_v42, %v852_v27  ;;  %v523_v3 = vrot.slane %v507_v24, %v852_v27  ;;  %v530_v47 = vrot.slane %v508_v44, %v852_v27  ;;  %v537_v4 = vrot.slane %v509_v51, %v852_v27 }
 0x145   :  { %v555_v6 = vcombine.low %v440_v31, %v447_v38  ;;  %v556_v60 = vcombine.low %v454_v20, %v461_v21  ;;  %v557_v61 = vcombine.low %v468_v56, %v475_v57  ;;  %v558_v53 = vcombine.low %v482_v58, %v489_v2 }
 0x146   :  { %v538_v62 = vcombine.low %v516_v46, %v523_v3  ;;  %v539_v25 = vcombine.low %v530_v47, %v537_v4 }
 0x147   :  { %v565_v63 = vrot.slane %v555_v6, %v852_v27  ;;  %v572_v7 = vrot.slane %v556_v60, %v852_v27  ;;  %v579_v1 = vrot.slane %v557_v61, %v852_v27  ;;  %v586_v26 = vrot.slane %v558_v53, %v852_v27 }
 0x148   :  { %v546_v14 = vrot.slane %v538_v62, %v852_v27  ;;  %v553_v32 = vrot.slane %v539_v25, %v852_v27 }
 0x149   :  { %v587_v13 = vcombine.low %v565_v63, %v572_v7  ;;  %v588_v9 = vcombine.low %v579_v1, %v586_v26 }
 0x14a   :  { %v554_v12 = vcombine.low %v546_v14, %v553_v32 }
 0x14b   :  { %v595_v8 = vrot.slane %v587_v13, %v852_v27  ;;  %v602_v15 = vrot.slane %v588_v9, %v852_v27 }
 0x14c   :  { %606 = vst [vmem:[%s960_s1] sm:$0xff] %v554_v12 }
 0x14d   :  { %v603_v33 = vcombine.low %v595_v8, %v602_v15 }
 0x14f   :  { %607 = vst [vmem:[%s960_s1 + $0x8] sm:$0xff] %v603_v33 }

</bundles_post_ra>
